<compile_context>
chip_gen: v5e
topology: v5e:2x2
jax: 0.10.0
libtpu: 0.0.40
codegen_flags: <defaults>
</compile_context>

<pallas_src>
import functools

import jax
import jax.numpy as jnp
from jax.experimental import pallas as pl
from jax.experimental.pallas import tpu as pltpu


def _self_attention_kernel(x_ref, wqkv_ref, bqkv_ref, wo_ref, bo_ref,
                           nbias_ref, eskew_ref, deint_ref, o_ref,
                           *, heads, embed_size):
    H, E = heads, embed_size
    x = x_ref[0]                                                   # (L*H, E)

    # Fused Q/K/V projection: one matmul for all heads and all three projections.
    # (The 1/sqrt(E) softmax scale is pre-folded into the Q columns host-side.)
    qkv = jnp.dot(x, wqkv_ref[...],
                  preferred_element_type=jnp.float32) + bqkv_ref[...]   # (LH, 3E)
    q = qkv[:, :E]                       # pre-scaled by 1/sqrt(E)
    k = qkv[:, E:2 * E]
    v = qkv[:, 2 * E:]

    # All-head attention scores in a single matmul; cross-head entries are killed
    # by the precomputed -1e30 bias so the row softmax reduces to per-head softmax.
    qk = jax.lax.dot_general(q, k, (((1,), (1,)), ((), ())),
                             preferred_element_type=jnp.float32)   # (LH, LH)
    logits = qk + nbias_ref[...]

    m = jnp.max(logits, axis=-1, keepdims=True)
    p = jnp.exp(logits - m)
    denom = jnp.sum(p, axis=-1, keepdims=True)
    attn = p * pl.reciprocal(denom, approx=True)

    # Relative-position term (mask + skew), fully vectorized:
    #   S[a, b] = sum_e q[a, e] * Eskew[a, b, e]
    # where Eskew was pre-skewed / pre-masked / head-block-diagonalized (and
    # pre-multiplied by sqrt(E) to undo the folded q scale) on the host.
    s_rel = jnp.sum(eskew_ref[...] * q[:, None, :], axis=-1)       # (LH, LH)
    attn = attn + s_rel                       # module adds S AFTER the softmax

    out = jnp.dot(attn, v, preferred_element_type=jnp.float32)     # (LH, E)
    z = jnp.dot(out, wo_ref[...],
                preferred_element_type=jnp.float32) + bo_ref[...]  # (LH, E)

    # Deinterleave rows (l*H + h) into a lane-dense (L, H*E) tile (H*E = 128)
    # using tiny one-hot selector matmuls, then one unmasked 128-lane store.
    parts = [jnp.dot(deint_ref[h], z, preferred_element_type=jnp.float32)
             for h in range(H)]
    o_ref[0] = jnp.concatenate(parts, axis=-1)                     # (L, H*E)


def _const_spec(shape):
    zeros = (0,) * len(shape)
    return pl.BlockSpec(shape, lambda n: zeros)


@functools.partial(jax.jit, static_argnames=("seq_len", "heads", "embed_size"))
def self_attention_forward(x, params, *, seq_len, heads, embed_size):
    N = x.shape[0]
    L, H, E = seq_len, heads, embed_size
    LH = L * H
    inv_scale = 1.0 / (float(E) ** 0.5)

    # Module semantics: only channel 0 of the last axis is used.
    x0 = x[:, :, :, 0].astype(jnp.float32)                         # (N, L*H, E)

    # --- Tiny host-side constants (no activation transposes) -------------------
    # Fused QKV weight / bias; softmax scale folded into the Q projection.
    w_qkv = jnp.concatenate(
        [params["wq"] * inv_scale, params["wk"], params["wv"]], axis=1)
    b_qkv = jnp.concatenate(
        [params["bq"] * inv_scale, params["bk"], params["bv"]], axis=1)

    # Cross-head additive mask for the block-diagonal softmax trick.
    head_id = jnp.arange(LH, dtype=jnp.int32) % H
    nbias = jnp.where(head_id[:, None] == head_id[None, :],
                      0.0, -1e30).astype(jnp.float32)              # (LH, LH)

    # Pre-skewed, pre-masked relative embedding (closed form of the PyTorch
    # pad/view/slice trick):  S[i, j] = QE[i, L-1-(i-j)] for j <= i, else 0.
    # Multiplied by sqrt(E) to compensate for the 1/sqrt(E) folded into q.
    i_idx = jnp.arange(L)
    j_idx = jnp.arange(L)
    rel = jnp.clip(L - 1 - i_idx[:, None] + j_idx[None, :], 0, L - 1)   # (L, L)
    keep = (j_idx[None, :] <= i_idx[:, None]).astype(jnp.float32)       # (L, L)
    esk = (params["E"][:, rel, :] * keep[None, :, :, None]
           * (float(E) ** 0.5))                                         # (H, L, L, E)
    eye_h = jnp.eye(H, dtype=jnp.float32)
    eskew = esk[:, :, :, None, :] * eye_h[:, None, None, :, None]       # (H, L, L, H, E)
    eskew = jnp.transpose(eskew, (1, 0, 2, 3, 4)).reshape(LH, LH, E)    # (LH, LH, E)

    # Row-deinterleave selectors: deint[h, l, a] = 1  iff  a == l*H + h.
    a_idx = jnp.arange(LH)
    deint = (a_idx[None, None, :] ==
             (jnp.arange(L)[None, :, None] * H +
              jnp.arange(H)[:, None, None])).astype(jnp.float32)        # (H, L, LH)

    kernel = functools.partial(_self_attention_kernel, heads=H, embed_size=E)

    out = pl.pallas_call(
        kernel,
        out_shape=jax.ShapeDtypeStruct((N, L, H * E), jnp.float32),
        grid=(N,),
        in_specs=[
            pl.BlockSpec((1, LH, E), lambda n: (n, 0, 0)),    # x   (per batch elem)
            _const_spec((E, 3 * E)),                          # fused Wqkv
            _const_spec((1, 3 * E)),                          # fused bqkv
            _const_spec((E, E)),                              # Wo
            _const_spec((1, E)),                              # bo
            _const_spec((LH, LH)),                            # cross-head -1e30 bias
            _const_spec((LH, LH, E)),                         # pre-skewed rel. emb.
            _const_spec((H, L, LH)),                          # deinterleave selectors
        ],
        out_specs=pl.BlockSpec((1, L, H * E), lambda n: (n, 0, 0)),
        compiler_params=pltpu.CompilerParams(
            dimension_semantics=("parallel",)),
    )(x0, w_qkv, b_qkv, params["wo"], params["bo"], nbias, eskew, deint)

    # (N, L, H*E) and (N, L*H, E) are the same row-major bytes -> free reshape.
    return out.reshape(N, LH, E)


def self_attention_reference(x, params, *, seq_len, heads, embed_size):
    """Pure-JAX mirror of the PyTorch forward (temporal, rel_emb, encoder)."""
    N = x.shape[0]
    L, H, E = seq_len, heads, embed_size

    x0 = x[:, :, :, 0].astype(jnp.float32)                          # (N, L*H, E)
    q = (x0 @ params["wq"] + params["bq"]).reshape(N, L, H, E)
    k = (x0 @ params["wk"] + params["bk"]).reshape(N, L, H, E)
    v = (x0 @ params["wv"] + params["bv"]).reshape(N, L, H, E)

    qh = q.transpose(0, 2, 1, 3)                                    # (N, H, L, E)
    QE = jnp.einsum('nhie,hme->nhim', qh, params["E"])              # (N, H, L, L)

    mask = jnp.flip(jnp.triu(jnp.ones((L, L), jnp.float32), 1), axis=1)
    QE = jnp.where(mask == 1, 0.0, QE)
    padded = jnp.pad(QE, ((0, 0), (0, 0), (0, 0), (1, 0)))
    s = padded.shape
    S = padded.reshape(s[0], s[1], s[3], s[2])[:, :, 1:, :]         # skew

    qk = jnp.einsum('nqhd,nkhd->nhqk', q, k)
    attn = jax.nn.softmax(qk / (float(E) ** 0.5), axis=3) + S
    z = jnp.einsum('nhql,nlhd->nqhd', attn, v).reshape(N, L * H, E)
    return z @ params["wo"] + params["bo"]


def init_params(key, *, seq_len, heads, embed_size):
    E, H, L = embed_size, heads, seq_len
    ks = jax.random.split(key, 9)
    xavier = (6.0 / (E + E)) ** 0.5

    def w(k):
        return jax.random.uniform(k, (E, E), jnp.float32, -xavier, xavier)

    def b(k):
        return jax.random.uniform(k, (1, E), jnp.float32, -0.05, 0.05)

    return {
        "wq": w(ks[0]), "bq": b(ks[1]),
        "wk": w(ks[2]), "bk": b(ks[3]),
        "wv": w(ks[4]), "bv": b(ks[5]),
        "wo": w(ks[6]), "bo": b(ks[7]),
        "E": jax.random.normal(ks[8], (H, L, E), jnp.float32),      # rel_emb param
    }


if __name__ == "__main__":
    N, seq_len, heads, embed_size, C = 2, 8, 4, 32, 2

    key = jax.random.PRNGKey(0)
    kx, kp = jax.random.split(key)
    # PyTorch-style input: (N, seq_len*heads, embed_size, C); only [..., 0] is used.
    x = jax.random.normal(kx, (N, seq_len * heads, embed_size, C), jnp.float32)
    params = init_params(kp, seq_len=seq_len, heads=heads, embed_size=embed_size)

    out = self_attention_forward(x, params, seq_len=seq_len, heads=heads,
                                 embed_size=embed_size)
    out = jax.block_until_ready(out)

    ref = self_attention_reference(x, params, seq_len=seq_len, heads=heads,
                                   embed_size=embed_size)
    ref = jax.block_until_ready(ref)

    assert out.shape == (N, seq_len * heads, embed_size)

    # Kernel matmuls run at DEFAULT MXU precision (single-pass bf16 inputs, f32
    # accumulation) and the softmax uses the approx EUP reciprocal, so the check
    # is scale-relative: structural / indexing bugs produce errors of O(10%+) of
    # the output scale, while bf16/approx noise stays well below 2%.
    scale = float(jnp.max(jnp.abs(ref)))
    max_err = float(jnp.max(jnp.abs(out - ref)))
    rel_rms = float(jnp.linalg.norm(out - ref) / jnp.linalg.norm(ref))
    assert max_err <= 2e-2 * scale + 1e-4, (max_err, scale)
    assert rel_rms <= 2e-2, rel_rms

    print("KERNEL_OK")
</pallas_src>

<mosaic_0001>
module attributes {stable_mosaic.version = 11 : i64} {
  func.func @_self_attention_kernel(%arg0: i32, %arg1: memref<1x32x32xf32, #tpu.memory_space<vmem>>, %arg2: memref<32x96xf32, #tpu.memory_space<vmem>>, %arg3: memref<1x96xf32, #tpu.memory_space<vmem>>, %arg4: memref<32x32xf32, #tpu.memory_space<vmem>>, %arg5: memref<1x32xf32, #tpu.memory_space<vmem>>, %arg6: memref<32x32xf32, #tpu.memory_space<vmem>>, %arg7: memref<32x32x32xf32, #tpu.memory_space<vmem>>, %arg8: memref<4x8x32xf32, #tpu.memory_space<vmem>>, %arg9: memref<1x8x128xf32, #tpu.memory_space<vmem>>) attributes {dimension_semantics = [#tpu.dimension_semantics<parallel>], iteration_bounds = array<i64: 2>, scalar_prefetch = 0 : i64, scratch_operands = 0 : i64, tpu.core_type = #tpu.core_type<tc>, window_params = [{transform_indices = @transform_0, window_bounds = array<i64: 1, 32, 32>}, {pipeline_mode = #tpu.pipeline_mode<synchronous>, transform_indices = @transform_1, window_bounds = array<i64: 32, 96>}, {pipeline_mode = #tpu.pipeline_mode<synchronous>, transform_indices = @transform_2, window_bounds = array<i64: 1, 96>}, {pipeline_mode = #tpu.pipeline_mode<synchronous>, transform_indices = @transform_3, window_bounds = array<i64: 32, 32>}, {pipeline_mode = #tpu.pipeline_mode<synchronous>, transform_indices = @transform_4, window_bounds = array<i64: 1, 32>}, {pipeline_mode = #tpu.pipeline_mode<synchronous>, transform_indices = @transform_5, window_bounds = array<i64: 32, 32>}, {pipeline_mode = #tpu.pipeline_mode<synchronous>, transform_indices = @transform_6, window_bounds = array<i64: 32, 32, 32>}, {pipeline_mode = #tpu.pipeline_mode<synchronous>, transform_indices = @transform_7, window_bounds = array<i64: 4, 8, 32>}, {transform_indices = @transform_8, window_bounds = array<i64: 1, 8, 128>}]} {
    %c0 = arith.constant 0 : index
    %c0_0 = arith.constant 0 : index
    %c0_1 = arith.constant 0 : index
    %0 = vector.load %arg1[%c0, %c0_0, %c0_1] : memref<1x32x32xf32, #tpu.memory_space<vmem>>, vector<1x32x32xf32>
    %1 = vector.shape_cast %0 : vector<1x32x32xf32> to vector<32x32xf32>
    %c0_2 = arith.constant 0 : index
    %c0_3 = arith.constant 0 : index
    %2 = vector.load %arg2[%c0_2, %c0_3] : memref<32x96xf32, #tpu.memory_space<vmem>>, vector<32x96xf32>
    %cst = arith.constant dense<0.000000e+00> : vector<32x96xf32>
    %3 = tpu.matmul %1, %2, %cst {dimension_numbers = #tpu.dot_dimension_numbers<[1], [0], [0], [1], [0, 0, 1, 1], [], []>} : vector<32x32xf32>, vector<32x96xf32>, vector<32x96xf32> -> vector<32x96xf32>
    %c0_4 = arith.constant 0 : index
    %c0_5 = arith.constant 0 : index
    %4 = vector.load %arg3[%c0_4, %c0_5] : memref<1x96xf32, #tpu.memory_space<vmem>>, vector<1x96xf32>
    %5 = vector.broadcast %4 : vector<1x96xf32> to vector<32x96xf32>
    %6 = arith.addf %3, %5 : vector<32x96xf32>
    %7 = vector.extract_strided_slice %6 {offsets = [0, 0], sizes = [32, 32], strides = [1, 1]} : vector<32x96xf32> to vector<32x32xf32>
    %8 = vector.extract_strided_slice %6 {offsets = [0, 32], sizes = [32, 32], strides = [1, 1]} : vector<32x96xf32> to vector<32x32xf32>
    %9 = vector.extract_strided_slice %6 {offsets = [0, 64], sizes = [32, 32], strides = [1, 1]} : vector<32x96xf32> to vector<32x32xf32>
    %cst_6 = arith.constant dense<0.000000e+00> : vector<32x32xf32>
    %10 = tpu.matmul %7, %8, %cst_6 {dimension_numbers = #tpu.dot_dimension_numbers<[1], [1], [0], [0], [0, 0, 1, 0], [], []>} : vector<32x32xf32>, vector<32x32xf32>, vector<32x32xf32> -> vector<32x32xf32>
    %c0_7 = arith.constant 0 : index
    %c0_8 = arith.constant 0 : index
    %11 = vector.load %arg6[%c0_7, %c0_8] : memref<32x32xf32, #tpu.memory_space<vmem>>, vector<32x32xf32>
    %12 = arith.addf %10, %11 : vector<32x32xf32>
    %cst_9 = arith.constant dense<0xFF800000> : vector<32xf32>
    %13 = vector.multi_reduction <maximumf>, %12, %cst_9 [1] : vector<32x32xf32> to vector<32xf32>
    %14 = vector.shape_cast %13 : vector<32xf32> to vector<32x1xf32>
    %15 = vector.broadcast %14 : vector<32x1xf32> to vector<32x32xf32>
    %16 = arith.subf %12, %15 : vector<32x32xf32>
    %17 = math.exp %16 : vector<32x32xf32>
    %cst_10 = arith.constant dense<0.000000e+00> : vector<32xf32>
    %18 = vector.multi_reduction <add>, %17, %cst_10 [1] : vector<32x32xf32> to vector<32xf32>
    %19 = vector.shape_cast %18 : vector<32xf32> to vector<32x1xf32>
    %20 = tpu.reciprocal %19 {approx = true} : vector<32x1xf32> -> vector<32x1xf32>
    %21 = vector.broadcast %20 : vector<32x1xf32> to vector<32x32xf32>
    %22 = arith.mulf %17, %21 : vector<32x32xf32>
    %c0_11 = arith.constant 0 : index
    %c0_12 = arith.constant 0 : index
    %c0_13 = arith.constant 0 : index
    %23 = vector.load %arg7[%c0_11, %c0_12, %c0_13] : memref<32x32x32xf32, #tpu.memory_space<vmem>>, vector<32x32x32xf32>
    %24 = vector.shape_cast %7 : vector<32x32xf32> to vector<32x1x32xf32>
    %25 = vector.broadcast %24 : vector<32x1x32xf32> to vector<32x32x32xf32>
    %26 = arith.mulf %23, %25 : vector<32x32x32xf32>
    %cst_14 = arith.constant dense<0.000000e+00> : vector<32x32xf32>
    %27 = vector.multi_reduction <add>, %26, %cst_14 [2] : vector<32x32x32xf32> to vector<32x32xf32>
    %28 = arith.addf %22, %27 : vector<32x32xf32>
    %cst_15 = arith.constant dense<0.000000e+00> : vector<32x32xf32>
    %29 = tpu.matmul %28, %9, %cst_15 {dimension_numbers = #tpu.dot_dimension_numbers<[1], [0], [0], [1], [0, 0, 1, 1], [], []>} : vector<32x32xf32>, vector<32x32xf32>, vector<32x32xf32> -> vector<32x32xf32>
    %c0_16 = arith.constant 0 : index
    %c0_17 = arith.constant 0 : index
    %30 = vector.load %arg4[%c0_16, %c0_17] : memref<32x32xf32, #tpu.memory_space<vmem>>, vector<32x32xf32>
    %cst_18 = arith.constant dense<0.000000e+00> : vector<32x32xf32>
    %31 = tpu.matmul %29, %30, %cst_18 {dimension_numbers = #tpu.dot_dimension_numbers<[1], [0], [0], [1], [0, 0, 1, 1], [], []>} : vector<32x32xf32>, vector<32x32xf32>, vector<32x32xf32> -> vector<32x32xf32>
    %c0_19 = arith.constant 0 : index
    %c0_20 = arith.constant 0 : index
    %32 = vector.load %arg5[%c0_19, %c0_20] : memref<1x32xf32, #tpu.memory_space<vmem>>, vector<1x32xf32>
    %33 = vector.broadcast %32 : vector<1x32xf32> to vector<32x32xf32>
    %34 = arith.addf %31, %33 : vector<32x32xf32>
    %c0_21 = arith.constant 0 : index
    %c0_22 = arith.constant 0 : index
    %c0_23 = arith.constant 0 : index
    %35 = vector.load %arg8[%c0_21, %c0_22, %c0_23] : memref<4x8x32xf32, #tpu.memory_space<vmem>>, vector<1x8x32xf32>
    %36 = vector.shape_cast %35 : vector<1x8x32xf32> to vector<8x32xf32>
    %cst_24 = arith.constant dense<0.000000e+00> : vector<8x32xf32>
    %37 = tpu.matmul %36, %34, %cst_24 {dimension_numbers = #tpu.dot_dimension_numbers<[1], [0], [0], [1], [0, 0, 1, 1], [], []>} : vector<8x32xf32>, vector<32x32xf32>, vector<8x32xf32> -> vector<8x32xf32>
    %c1 = arith.constant 1 : index
    %c0_25 = arith.constant 0 : index
    %c0_26 = arith.constant 0 : index
    %38 = vector.load %arg8[%c1, %c0_25, %c0_26] : memref<4x8x32xf32, #tpu.memory_space<vmem>>, vector<1x8x32xf32>
    %39 = vector.shape_cast %38 : vector<1x8x32xf32> to vector<8x32xf32>
    %cst_27 = arith.constant dense<0.000000e+00> : vector<8x32xf32>
    %40 = tpu.matmul %39, %34, %cst_27 {dimension_numbers = #tpu.dot_dimension_numbers<[1], [0], [0], [1], [0, 0, 1, 1], [], []>} : vector<8x32xf32>, vector<32x32xf32>, vector<8x32xf32> -> vector<8x32xf32>
    %c2 = arith.constant 2 : index
    %c0_28 = arith.constant 0 : index
    %c0_29 = arith.constant 0 : index
    %41 = vector.load %arg8[%c2, %c0_28, %c0_29] : memref<4x8x32xf32, #tpu.memory_space<vmem>>, vector<1x8x32xf32>
    %42 = vector.shape_cast %41 : vector<1x8x32xf32> to vector<8x32xf32>
    %cst_30 = arith.constant dense<0.000000e+00> : vector<8x32xf32>
    %43 = tpu.matmul %42, %34, %cst_30 {dimension_numbers = #tpu.dot_dimension_numbers<[1], [0], [0], [1], [0, 0, 1, 1], [], []>} : vector<8x32xf32>, vector<32x32xf32>, vector<8x32xf32> -> vector<8x32xf32>
    %c3 = arith.constant 3 : index
    %c0_31 = arith.constant 0 : index
    %c0_32 = arith.constant 0 : index
    %44 = vector.load %arg8[%c3, %c0_31, %c0_32] : memref<4x8x32xf32, #tpu.memory_space<vmem>>, vector<1x8x32xf32>
    %45 = vector.shape_cast %44 : vector<1x8x32xf32> to vector<8x32xf32>
    %cst_33 = arith.constant dense<0.000000e+00> : vector<8x32xf32>
    %46 = tpu.matmul %45, %34, %cst_33 {dimension_numbers = #tpu.dot_dimension_numbers<[1], [0], [0], [1], [0, 0, 1, 1], [], []>} : vector<8x32xf32>, vector<32x32xf32>, vector<8x32xf32> -> vector<8x32xf32>
    %47 = tpu.concatenate %37, %40, %43, %46 in 1 : vector<8x32xf32>, vector<8x32xf32>, vector<8x32xf32>, vector<8x32xf32> -> vector<8x128xf32>
    %c0_34 = arith.constant 0 : index
    %c0_35 = arith.constant 0 : index
    %c0_36 = arith.constant 0 : index
    %48 = vector.load %arg9[%c0_34, %c0_35, %c0_36] : memref<1x8x128xf32, #tpu.memory_space<vmem>>, vector<1x8x128xf32>
    %49 = vector.shape_cast %48 : vector<1x8x128xf32> to vector<8x128xf32>
    %50 = vector.shape_cast %47 : vector<8x128xf32> to vector<1x8x128xf32>
    tpu.vector_store %arg9[%c0_34, %c0_35, %c0_36], %50 {strides = array<i32>} : memref<1x8x128xf32, #tpu.memory_space<vmem>>, vector<1x8x128xf32>,
    return
  }
  func.func @transform_0(%arg0: i32) -> (i32, i32, i32) {
    %c0_i32 = arith.constant 0 : i32
    %c0_i32_0 = arith.constant 0 : i32
    %c0_i32_1 = arith.constant 0 : i32
    return %arg0, %c0_i32, %c0_i32_0 : i32, i32, i32
  }
  func.func @transform_1(%arg0: i32) -> (i32, i32) {
    %c0_i32 = arith.constant 0 : i32
    %c0_i32_0 = arith.constant 0 : i32
    %c0_i32_1 = arith.constant 0 : i32
    return %c0_i32, %c0_i32_0 : i32, i32
  }
  func.func @transform_2(%arg0: i32) -> (i32, i32) {
    %c0_i32 = arith.constant 0 : i32
    %c0_i32_0 = arith.constant 0 : i32
    %c0_i32_1 = arith.constant 0 : i32
    return %c0_i32, %c0_i32_0 : i32, i32
  }
  func.func @transform_3(%arg0: i32) -> (i32, i32) {
    %c0_i32 = arith.constant 0 : i32
    %c0_i32_0 = arith.constant 0 : i32
    %c0_i32_1 = arith.constant 0 : i32
    return %c0_i32, %c0_i32_0 : i32, i32
  }
  func.func @transform_4(%arg0: i32) -> (i32, i32) {
    %c0_i32 = arith.constant 0 : i32
    %c0_i32_0 = arith.constant 0 : i32
    %c0_i32_1 = arith.constant 0 : i32
    return %c0_i32, %c0_i32_0 : i32, i32
  }
  func.func @transform_5(%arg0: i32) -> (i32, i32) {
    %c0_i32 = arith.constant 0 : i32
    %c0_i32_0 = arith.constant 0 : i32
    %c0_i32_1 = arith.constant 0 : i32
    return %c0_i32, %c0_i32_0 : i32, i32
  }
  func.func @transform_6(%arg0: i32) -> (i32, i32, i32) {
    %c0_i32 = arith.constant 0 : i32
    %c0_i32_0 = arith.constant 0 : i32
    %c0_i32_1 = arith.constant 0 : i32
    %c0_i32_2 = arith.constant 0 : i32
    return %c0_i32, %c0_i32_0, %c0_i32_1 : i32, i32, i32
  }
  func.func @transform_7(%arg0: i32) -> (i32, i32, i32) {
    %c0_i32 = arith.constant 0 : i32
    %c0_i32_0 = arith.constant 0 : i32
    %c0_i32_1 = arith.constant 0 : i32
    %c0_i32_2 = arith.constant 0 : i32
    return %c0_i32, %c0_i32_0, %c0_i32_1 : i32, i32, i32
  }
  func.func @transform_8(%arg0: i32) -> (i32, i32, i32) {
    %c0_i32 = arith.constant 0 : i32
    %c0_i32_0 = arith.constant 0 : i32
    %c0_i32_1 = arith.constant 0 : i32
    return %arg0, %c0_i32, %c0_i32_0 : i32, i32, i32
  }
}

</mosaic_0001>

<bundles_post_ra>
// kernel: self_attention_forward.1
= control target key start
LH: loop header
LB: loop body
LE: loop exit
PB: predicated region body
PF: predicated region fallthrough
CT: control target
= control target key end

     0   :  { %s2003_s27 = smov 0   ;;  %s3230_s0 = inlined_call_operand.vmem [shape: f32[2,32,32], index: 0, kind: input, shape index: {}]   ;;  %s3231_s1 = inlined_call_operand.vmem [shape: f32[32,96], index: 1, kind: input, shape index: {}]   ;;  %s3232_s2 = inlined_call_operand.vmem [shape: f32[1,96], index: 2, kind: input, shape index: {}]   ;;  %s3233_s3 = inlined_call_operand.vmem [shape: f32[32,32], index: 3, kind: input, shape index: {}]   ;;  %s3234_s4 = inlined_call_operand.vmem [shape: f32[1,32], index: 4, kind: input, shape index: {}]   ;;  %s3235_s5 = inlined_call_operand.vmem [shape: f32[32,32], index: 5, kind: input, shape index: {}]   ;;  %s3236_s6 = inlined_call_operand.vmem [shape: f32[32,32,32], index: 6, kind: input, shape index: {}]   ;;  %s3237_s7 = inlined_call_operand.vmem [shape: f32[4,8,32], index: 7, kind: input, shape index: {}]   ;;  %s3238_s8 = inlined_call_operand.vmem [shape: f32[2,8,128], index: 8, kind: output, shape index: {}]  }
   0x1 LB: > { %s1870_s28 = sadd.s32 4294967295, %s1953_s27   ;;  %p1874_p0 = scmp.ge.s32.totalorder %s1953_s27, 1  ;;  %s1953_s27 = sphi %s2003_s27, %s18_s27  }
   0x2   : > { %p262_p1 = scmp.lt.s32.totalorder %s1953_s27, 3 }
   0x4   : > { %p263_p2 = pnand %p1874_p0, %p262_p1 }
   0x5   : > { %p295_p3 = scmp.lt.s32.totalorder (!%p263_p2), %s1870_s28, 1  ;;  %s1955_s23 = smov (!%p263_p2), 96  }
   0x6   : > { %266 = sbr.rel (%p263_p2) target bundleno = 1370 (0x55a), region = 52  ;;  %s1956_s11 = smov (!%p263_p2), 64  }
   0x7   : > { %s1957_s9 = smov (!%p263_p2), 32  }
   0xb   : > { %v311_v0 = vld [vmem:[%s3231_s1 + $0x18] sm:$0xff]  ;;  %v310_v1 = vld [vmem:[%s3231_s1 + $0x10] sm:$0xff]  ;;  %v309_v2 = vld [vmem:[%s3231_s1 + $0x8] sm:$0xff]  ;;  %s3240_s28 = smov (!%p295_p3, %s1870_s28), 1  ;;  %vm316_vm0 = vcmask 261120   ;;  %vm1328_vm1 = vcmask 130112  }
   0xc   : > { %341 = vmatpush.msra.mxu0 %v311_v0  ;;  %v308_v3 = vld [vmem:[%s3231_s1] sm:$0xff]  ;;  %s1907_s15 = sshll.u32 %s3240_s28, 5  ;;  %v464_v20 = vld [vmem:[%s3236_s6 + $0x8] sm:$0xff]  ;;  %v470_v23 = vld [vmem:[%s3236_s6 + $0x38] sm:$0xff]  ;;  %vm1332_vm2 = vcmask 195712   ;;  %vm1336_vm3 = vcmask 261312  }
   0xd   : > { %s299_s18 = scalar_lea.vmem %s3230_s0, %s1907_s15  ;;  %v2036_v8 = vld [vmem:[%s3232_s2] ss:$0 sm:$0xff]  ;;  %v465_v28 = vld [vmem:[%s3236_s6 + $0x10] sm:$0xff]  ;;  %v476_v31 = vld [vmem:[%s3236_s6 + $0x68] sm:$0xff]  ;;  %vm1555_vm4 = vcmask 1041409   ;;  %vm1557_vm5 = vcmask 1042434  }
   0xe   : > { %342 = vmatpush.msra.mxu0 %v310_v1  ;;  %v304_v4 = vld [vmem:[%s299_s18] sm:$0xff]  ;;  %v305_v5 = vld [vmem:[%s299_s18 + $0x8] sm:$0xff]  ;;  %v306_v6 = vld [vmem:[%s299_s18 + $0x10] sm:$0xff]  ;;  %vm1559_vm6 = vcmask 1043459   ;;  %vm1561_vm7 = vcmask 1044484   ;;  %vm1563_vm8 = vcmask 1045509  }
   0xf   : > { %v307_v7 = vld [vmem:[%s299_s18 + $0x18] sm:$0xff]  ;;  %v463_v11 = vld [vmem:[%s3236_s6] sm:$0xff]  ;;  %v477_v37 = vld [vmem:[%s3236_s6 + $0x70] sm:$0xff]  ;;  %vm1565_vm9 = vcmask 1046534   ;;  %vm1567_vm10 = vcmask 1047559   ;;  %vm1812_vm11 = vcmask 523264  }
  0x10   : > { %343 = vmatpush.msra.mxu0 %v309_v2  ;;  %v471_v14 = vld [vmem:[%s3236_s6 + $0x40] sm:$0xff]  ;;  %v466_v35 = vld [vmem:[%s3236_s6 + $0x18] sm:$0xff]  ;;  %v472_v46 = vld [vmem:[%s3236_s6 + $0x48] sm:$0xff]  ;;  %s1877_s10 = sshll.u32 %s3240_s28, 3  ;;  %vm1814_vm12 = vcmask 785408  }
  0x11   : > { %v467_v41 = vld [vmem:[%s3236_s6 + $0x20] sm:$0xff]  ;;  %v478_v43 = vld [vmem:[%s3236_s6 + $0x78] sm:$0xff]  ;;  %v468_v50 = vld [vmem:[%s3236_s6 + $0x28] sm:$0xff]  ;;  %s303_s14 = scalar_lea.vmem %s3238_s8, %s1877_s10 }
  0x12   : > { %344 = vmatpush.msra.mxu0 %v308_v3  ;;  %v484_v53 = vld [vmem:[%s3236_s6 + $0xa8] sm:$0xff]  ;;  %v473_v57 = vld [vmem:[%s3236_s6 + $0x50] sm:$0xff]  ;;  %v487_v1 = vld [vmem:[%s3236_s6 + $0xc0] sm:$0xff] }
  0x13   : > { %1878 = vmatmul.msk.f32.vlgmr.msra.gmra.mxu0 %vm316_vm0, %v304_v4  ;;  %v469_v61 = vld [vmem:[%s3236_s6 + $0x30] sm:$0xff] }
  0x1b   : > { %1879 = vmatmul.msk.f32.gmra.mxu0 %vm316_vm0, %v305_v5 }
  0x23   : > { %1880 = vmatmul.msk.f32.gmra.mxu0 %vm316_vm0, %v306_v6  ;;  %v479_v6 = vld [vmem:[%s3236_s6 + $0x80] sm:$0xff] }
  0x2b   : > { %1881 = vmatmul.msk.f32.gmra.mxu0 %vm316_vm0, %v307_v7 }
  0x90   : > { %v346_v9 = vpop.f32.mrf.mxu0 }
  0x91   : > { %v2039_v10 = vadd.f32 %v2036_v8, %v346_v9 }
  0x93   : > { %366 = vrot.lane.b32.xlu1 %v2039_v10, %s1955_s23  ;;  %v619_v12 = vperm.slane %v2039_v10, 0  ;;  %v592_v13 = vrot.slane %v2039_v10, 2  ;;  %v591_v17 = vrot.slane %v2039_v10, 1  ;;  %v593_v26 = vrot.slane %v2039_v10, 3 }
  0x94   : > { %v595_v47 = vrot.slane %v2039_v10, 5  ;;  %v596_v58 = vrot.slane %v2039_v10, 6  ;;  %v594_v62 = vrot.slane %v2039_v10, 4 }
  0x95   : > { %v683_v15 = vmul.f32 %v619_v12, %v463_v11  ;;  %v2051_v16 = vperm.slane %v592_v13, 0  ;;  %v620_v22 = vperm.slane %v591_v17, 0  ;;  %v684_v24 = vmul.f32 %v619_v12, %v464_v20  ;;  %v475_v11 = vld [vmem:[%s3236_s6 + $0x60] sm:$0xff]  ;;  %v489_v13 = vld [vmem:[%s3236_s6 + $0xd0] sm:$0xff] }
  0x96   : > { %v622_v30 = vperm.slane %v593_v26, 0  ;;  %v685_v32 = vmul.f32 %v619_v12, %v465_v28  ;;  %v686_v38 = vmul.f32 %v619_v12, %v466_v35  ;;  %v2098_v52 = vperm.slane %v595_v47, 0 }
  0x97   : > { %v811_v18 = vsel %vm316_vm0, %v683_v15, 0.0  ;;  %v691_v19 = vmul.f32 %v2051_v16, %v471_v14  ;;  %v690_v25 = vmul.f32 %v620_v22, %v470_v23  ;;  %v814_v27 = vsel %vm316_vm0, %v684_v24, 0.0  ;;  %v490_v24 = vld [vmem:[%s3236_s6 + $0xd8] sm:$0xff] }
  0x98   : > { %812 = vadd.xlane.f32.xlu2 %v811_v18  ;;  %v696_v33 = vmul.f32 %v622_v30, %v476_v31  ;;  %v817_v34 = vsel %vm316_vm0, %v685_v32, 0.0  ;;  %v697_v39 = vmul.f32 %v622_v30, %v477_v37  ;;  %v820_v40 = vsel %vm316_vm0, %v686_v38, 0.0  ;;  %v481_v18 = vld [vmem:[%s3236_s6 + $0x90] sm:$0xff]  ;;  %v349_v23 = vpop.f32.mrf.mxu0  ;;  %v488_v38 = vld [vmem:[%s3236_s6 + $0xc8] sm:$0xff] }
  0x99   : > { %v835_v21 = vsel %vm316_vm0, %v691_v19, 0.0  ;;  %v832_v29 = vsel %vm316_vm0, %v690_v25, 0.0  ;;  %v687_v44 = vmul.f32 %v620_v22, %v467_v41  ;;  %v698_v45 = vmul.f32 %v622_v30, %v478_v43  ;;  %v483_v43 = vld [vmem:[%s3236_s6 + $0xa0] sm:$0xff] }
  0x9a   : > { %836 = vadd.xlane.f32.xlu0 %v835_v21  ;;  %v850_v36 = vsel %vm316_vm0, %v696_v33, 0.0  ;;  %v853_v42 = vsel %vm316_vm0, %v697_v39, 0.0  ;;  %v692_v49 = vmul.f32 %v2051_v16, %v472_v46  ;;  %v688_v54 = vmul.f32 %v620_v22, %v468_v50  ;;  %v474_v21 = vld [vmem:[%s3236_s6 + $0x58] sm:$0xff]  ;;  %v495_v33 = vld [vmem:[%s3236_s6 + $0x100] sm:$0xff]  ;;  %v500_v46 = vld [vmem:[%s3236_s6 + $0x128] sm:$0xff] }
  0x9b   : > { %v823_v48 = vsel %vm316_vm0, %v687_v44, 0.0  ;;  %v856_v51 = vsel %vm316_vm0, %v698_v45, 0.0  ;;  %v704_v56 = vmul.f32 %v2098_v52, %v484_v53  ;;  %v693_v60 = vmul.f32 %v2051_v16, %v473_v57  ;;  %v501_v57 = vld [vmem:[%s3236_s6 + $0x130] sm:$0xff] }
  0x9c   : > { %v838_v55 = vsel %vm316_vm0, %v692_v49, 0.0  ;;  %v826_v59 = vsel %vm316_vm0, %v688_v54, 0.0  ;;  %v625_v0 = vperm.slane %v596_v58, 0  ;;  %v689_v2 = vmul.f32 %v620_v22, %v469_v61  ;;  %v493_v61 = vld [vmem:[%s3236_s6 + $0xf0] sm:$0xff] }
  0x9d   : > { %v874_v63 = vsel %vm316_vm0, %v704_v56, 0.0  ;;  %v841_v3 = vsel %vm316_vm0, %v693_v60, 0.0  ;;  %v623_v4 = vperm.slane %v594_v62, 0  ;;  %v695_v14 = vmul.f32 %v622_v30, %v475_v11  ;;  %v492_v11 = vld [vmem:[%s3236_s6 + $0xe8] sm:$0xff] }
  0x9e   : > { %v707_v5 = vmul.f32 %v625_v0, %v487_v1  ;;  %v829_v7 = vsel %vm316_vm0, %v689_v2, 0.0  ;;  %v709_v17 = vmul.f32 %v625_v0, %v489_v13  ;;  %v694_v25 = vmul.f32 %v2051_v16, %v474_v21  ;;  %v480_v16 = vld [vmem:[%s3236_s6 + $0x88] sm:$0xff]  ;;  %v486_v1 = vld [vmem:[%s3236_s6 + $0xb8] sm:$0xff] }
  0x9f   : > { %v699_v9 = vmul.f32 %v623_v4, %v479_v6  ;;  %v847_v19 = vsel %vm316_vm0, %v695_v14, 0.0  ;;  %v701_v20 = vmul.f32 %v623_v4, %v481_v18  ;;  %v710_v28 = vmul.f32 %v625_v0, %v490_v24  ;;  %v502_v13 = vld [vmem:[%s3236_s6 + $0x138] sm:$0xff]  ;;  %v508_v21 = vld [vmem:[%s3236_s6 + $0x168] sm:$0xff] }
  0xa0   : > { %815 = vadd.xlane.f32.xlu2 %v814_v27  ;;  %v883_v12 = vsel %vm316_vm0, %v707_v5, 0.0  ;;  %v889_v22 = vsel %vm316_vm0, %v709_v17, 0.0  ;;  %v2146_v27 = vadd.f32 %v2036_v8, %v349_v23  ;;  %v844_v30 = vsel %vm316_vm0, %v694_v25, 0.0  ;;  %v494_v18 = vld [vmem:[%s3236_s6 + $0xf8] sm:$0xff]  ;;  %v497_v25 = vld [vmem:[%s3236_s6 + $0x110] sm:$0xff] }
  0xa1   : > { %v859_v15 = vsel %vm316_vm0, %v699_v9, 0.0  ;;  %v865_v26 = vsel %vm316_vm0, %v701_v20, 0.0  ;;  %v700_v35 = vmul.f32 %v623_v4, %v480_v16  ;;  %v597_v44 = vrot.slane %v2039_v10, 7 }
  0xa2   : > { %833 = vadd.xlane.f32.xlu0 %v832_v29  ;;  %v482_v29 = vld [vmem:[%s3236_s6 + $0x98] sm:$0xff]  ;;  %v2153_v31 = vperm.slane %v2146_v27, 0  ;;  %v598_v39 = vrot.slane %v2146_v27, 1  ;;  %v703_v47 = vmul.f32 %v2098_v52, %v483_v43  ;;  %v599_v62 = vrot.slane %v2146_v27, 2 }
  0xa3   : > { %v702_v32 = vmul.f32 %v623_v4, %v482_v29  ;;  %v626_v49 = vperm.slane %v597_v44, 0  ;;  %v504_v4 = vld [vmem:[%s3236_s6 + $0x148] sm:$0xff]  ;;  %v706_v5 = vmul.f32 %v2098_v52, %v486_v1  ;;  %v506_v29 = vld [vmem:[%s3236_s6 + $0x158] sm:$0xff] }
  0xa4   : > { %v2174_v45 = vperm.slane %v598_v39, 0  ;;  %v871_v53 = vsel %vm316_vm0, %v703_v47, 0.0 }
  0xa5   : > { %v868_v37 = vsel %vm316_vm0, %v702_v32, 0.0  ;;  %v880_v9 = vsel %vm316_vm0, %v706_v5, 0.0  ;;  %v717_v32 = vmul.f32 %v2153_v31, %v497_v25 }
  0xa6   : > { %v720_v50 = vmul.f32 %v2174_v45, %v500_v46  ;;  %v721_v60 = vmul.f32 %v2174_v45, %v501_v57  ;;  %v722_v14 = vmul.f32 %v2174_v45, %v502_v13  ;;  %v496_v13 = vld [vmem:[%s3236_s6 + $0x108] sm:$0xff] }
  0xa8   : > { %818 = vadd.xlane.f32.xlu2 %v817_v34  ;;  %v892_v34 = vsel %vm316_vm0, %v710_v28, 0.0  ;;  %v922_v56 = vsel %vm316_vm0, %v720_v50, 0.0  ;;  %v925_v2 = vsel %vm316_vm0, %v721_v60, 0.0  ;;  %v1323_v28 = vlaneseq }
  0xaa   : > { %851 = vadd.xlane.f32.xlu0 %v850_v36  ;;  %v715_v36 = vmul.f32 %v2153_v31, %v495_v33 }
  0xac   : > { %v907_v41 = vsel %vm316_vm0, %v715_v36, 0.0 }
  0xb0   : > { %821 = vadd.xlane.f32.xlu2 %v820_v40  ;;  %v862_v40 = vsel %vm316_vm0, %v700_v35, 0.0  ;;  %v913_v35 = vsel %vm316_vm0, %v717_v32, 0.0 }
  0xb2   : > { %854 = vadd.xlane.f32.xlu0 %v853_v42  ;;  %v708_v42 = vmul.f32 %v625_v0, %v488_v38  ;;  %v713_v0 = vmul.f32 %v626_v49, %v493_v61 }
  0xb4   : > { %v901_v6 = vsel %vm316_vm0, %v713_v0, 0.0 }
  0xb8   : > { %824 = vadd.xlane.f32.xlu2 %v823_v48  ;;  %v886_v48 = vsel %vm316_vm0, %v708_v42, 0.0 }
  0xba   : > { %857 = vadd.xlane.f32.xlu0 %v856_v51  ;;  %v491_v51 = vld [vmem:[%s3236_s6 + $0xe0] sm:$0xff] }
  0xbb   : > { %v711_v54 = vmul.f32 %v626_v49, %v491_v51 }
  0xbd   : > { %839 = vadd.xlane.f32.xlu1 %v838_v55  ;;  %v485_v55 = vld [vmem:[%s3236_s6 + $0xb0] sm:$0xff] }
  0xbe   : > { %v705_v58 = vmul.f32 %v2098_v52, %v485_v55  ;;  %v712_v52 = vmul.f32 %v626_v49, %v492_v11 }
  0xc0   : > { %827 = vadd.xlane.f32.xlu2 %v826_v59  ;;  %v895_v59 = vsel %vm316_vm0, %v711_v54, 0.0  ;;  %v898_v17 = vsel %vm316_vm0, %v712_v52, 0.0  ;;  %v352_v54 = vpop.f32.mrf.mxu0  ;;  %v509_v52 = vld [vmem:[%s3236_s6 + $0x170] sm:$0xff] }
  0xc2   : > { %875 = vadd.xlane.f32.xlu0 %v874_v63  ;;  %v877_v63 = vsel %vm316_vm0, %v705_v58, 0.0  ;;  %v2284_v58 = vadd.f32 %v2036_v8, %v352_v54 }
  0xc5   : > { %842 = vadd.xlane.f32.xlu1 %v841_v3  ;;  %v2205_v3 = vperm.slane %v599_v62, 0 }
  0xc7   : > { %v726_v33 = vmul.f32 %v2205_v3, %v506_v29  ;;  %v505_v29 = vld [vmem:[%s3236_s6 + $0x150] sm:$0xff] }
  0xc8   : > { %830 = vadd.xlane.f32.xlu2 %v829_v7  ;;  %v724_v7 = vmul.f32 %v2205_v3, %v504_v4  ;;  %v355_v4 = vpop.f32.mrf.mxu0 }
  0xc9   : > { %v940_v38 = vsel %vm316_vm0, %v726_v33, 0.0 }
  0xca   : > { %884 = vadd.xlane.f32.xlu0 %v883_v12  ;;  %v934_v12 = vsel %vm316_vm0, %v724_v7, 0.0  ;;  %v2301_v7 = vadd.f32 %v2036_v8, %v355_v4  ;;  %v716_v8 = vmul.f32 %v2153_v31, %v496_v13 }
  0xcd   : > { %860 = vadd.xlane.f32.xlu1 %v859_v15  ;;  %v600_v15 = vrot.slane %v2146_v27, 3 }
  0xcf   : > { %v2228_v20 = vperm.slane %v600_v15, 0 }
  0xd0   : > { %848 = vadd.xlane.f32.xlu2 %v847_v19  ;;  %v928_v19 = vsel %vm316_vm0, %v722_v14, 0.0 }
  0xd1   : > { %v728_v23 = vmul.f32 %v2228_v20, %v508_v21  ;;  %v729_v15 = vmul.f32 %v2228_v20, %v509_v52 }
  0xd2   : > { %890 = vadd.xlane.f32.xlu0 %v889_v22  ;;  %v714_v22 = vmul.f32 %v626_v49, %v494_v18 }
  0xd3   : > { %v949_v25 = vsel %vm316_vm0, %v729_v15, 0.0  ;;  %v511_v15 = vld [vmem:[%s3236_s6 + $0x180] sm:$0xff] }
  0xd4   : > { %v904_v24 = vsel %vm316_vm0, %v714_v22, 0.0 }
  0xd5   : > { %866 = vadd.xlane.f32.xlu1 %v865_v26  ;;  %v946_v26 = vsel %vm316_vm0, %v728_v23, 0.0 }
  0xd8   : > { %845 = vadd.xlane.f32.xlu2 %v844_v30 }
  0xda   : > { %893 = vadd.xlane.f32.xlu0 %v892_v34  ;;  %v2246_v34 = vand.u32 127, %v1323_v28 }
  0xdc   : > { %v2252_v36 = vadd.s32 4294967288, %v2246_v34  ;;  %v2266_v47 = vadd.s32 4294967280, %v2246_v34  ;;  %v2281_v57 = vadd.s32 4294967272, %v2246_v34 }
  0xdd   : > { %869 = vadd.xlane.f32.xlu1 %v868_v37  ;;  %v499_v37 = vld [vmem:[%s3236_s6 + $0x120] sm:$0xff] }
  0xe0   : > { %863 = vadd.xlane.f32.xlu2 %v862_v40  ;;  %v719_v40 = vmul.f32 %v2174_v45, %v499_v37 }
  0xe2   : > { %908 = vadd.xlane.f32.xlu0 %v907_v41  ;;  %v919_v46 = vsel %vm316_vm0, %v719_v40, 0.0 }
  0xe5   : > { %887 = vadd.xlane.f32.xlu1 %v886_v48  ;;  %v503_v48 = vld [vmem:[%s3236_s6 + $0x140] sm:$0xff] }
  0xe6   : > { %v723_v49 = vmul.f32 %v2205_v3, %v503_v48 }
  0xe8   : > { %872 = vadd.xlane.f32.xlu2 %v871_v53  ;;  %v931_v55 = vsel %vm316_vm0, %v723_v49, 0.0 }
  0xea   : > { %923 = vadd.xlane.f32.xlu0 %v922_v56  ;;  %v498_v56 = vld [vmem:[%s3236_s6 + $0x118] sm:$0xff] }
  0xeb   : > { %v718_v60 = vmul.f32 %v2153_v31, %v498_v56 }
  0xed   : > { %896 = vadd.xlane.f32.xlu1 %v895_v59  ;;  %v916_v0 = vsel %vm316_vm0, %v718_v60, 0.0 }
  0xf0   : > { %878 = vadd.xlane.f32.xlu2 %v877_v63 }
  0xf2   : > { %926 = vadd.xlane.f32.xlu0 %v925_v2  ;;  %v507_v2 = vld [vmem:[%s3236_s6 + $0x160] sm:$0xff] }
  0xf5   : > { %902 = vadd.xlane.f32.xlu1 %v901_v6  ;;  %v727_v6 = vmul.f32 %v2228_v20, %v507_v2 }
  0xf7   : > { %v943_v11 = vsel %vm316_vm0, %v727_v6, 0.0 }
  0xf8   : > { %881 = vadd.xlane.f32.xlu2 %v880_v9 }
  0xfa   : > { %935 = vadd.xlane.f32.xlu0 %v934_v12 }
 0x100   : > { %899 = vadd.xlane.f32.xlu2 %v898_v17  ;;  %v601_v17 = vrot.slane %v2146_v27, 4 }
 0x102   : > { %929 = vadd.xlane.f32.xlu0 %v928_v19 }
 0x105   : > { %v2294_v1 = vpop.permute.xlu1 %366 }
 0x108   : > { %905 = vadd.xlane.f32.xlu2 %v904_v24  ;;  %v910_v24 = vsel %vm316_vm0, %v716_v8, 0.0 }
 0x10a   : > { %947 = vadd.xlane.f32.xlu0 %v946_v26  ;;  %v2323_v26 = vperm.slane %v601_v17, 0 }
 0x10b   : > { %v813_v30 = vpop.xlane.xlu2 %812 }
 0x10c   : > { %v1325_v41 = vperm.slane %v813_v30, %v2246_v34  ;;  %v512_v30 = vld [vmem:[%s3236_s6 + $0x188] sm:$0xff] }
 0x10d   : > { %v2243_v16 = vpop.xlane.xlu0 %836 }
 0x10e   : > { %368 = vrot.lane.b32.xlu1 %v2146_v27, %s1955_s23  ;;  %v1345_v31 = vperm.slane %v2243_v16, %v2246_v34  ;;  %v725_v16 = vmul.f32 %v2205_v3, %v505_v29 }
 0x110   : > { %914 = vadd.xlane.f32.xlu2 %v913_v35  ;;  %v937_v48 = vsel %vm316_vm0, %v725_v16, 0.0 }
 0x112   : > { %941 = vadd.xlane.f32.xlu0 %v940_v38  ;;  %v732_v38 = vmul.f32 %v2323_v26, %v512_v30 }
 0x113   : > { %v816_v39 = vpop.xlane.xlu2 %815 }
 0x114   : > { %v1327_v42 = vperm.slane %v816_v39, %v2252_v36  ;;  %v602_v39 = vrot.slane %v2146_v27, 5 }
 0x115   : > { %v2261_v43 = vpop.xlane.xlu0 %833 }
 0x116   : > { %v1329_v44 = vsel %vm1328_vm1, %v1327_v42, %v1325_v41  ;;  %v1343_v41 = vperm.slane %v2261_v43, %v2281_v57  ;;  %v2346_v3 = vperm.slane %v602_v39, 0  ;;  %v513_v43 = vld [vmem:[%s3236_s6 + $0x190] sm:$0xff] }
 0x117   : > { %v733_v56 = vmul.f32 %v2323_v26, %v513_v43  ;;  %v1919_v43 = vpack.i.bf16 %v2039_v10, %v2146_v27 }
 0x118   : > { %920 = vadd.xlane.f32.xlu2 %v919_v46 }
 0x119   : > { %v961_v6 = vsel %vm316_vm0, %v733_v56, 0.0 }
 0x11b   : > { %v819_v45 = vpop.xlane.xlu2 %818 }
 0x11c   : > { %v1331_v50 = vperm.slane %v819_v45, %v2266_v47  ;;  %v958_v45 = vsel %vm316_vm0, %v732_v38, 0.0 }
 0x11d   : > { %v2273_v51 = vpop.xlane.xlu0 %851 }
 0x11e   : > { %v1333_v53 = vsel %vm1332_vm2, %v1331_v50, %v1329_v44  ;;  %v516_v50 = vld [vmem:[%s3236_s6 + $0x1a8] sm:$0xff] }
 0x120   : > { %932 = vadd.xlane.f32.xlu2 %v931_v55  ;;  %v736_v55 = vmul.f32 %v2346_v3, %v516_v50 }
 0x123   : > { %v822_v59 = vpop.xlane.xlu2 %821 }
 0x124   : > { %v1335_v61 = vperm.slane %v822_v59, %v2281_v57  ;;  %v1353_v59 = vperm.slane %v2273_v51, %v2252_v36 }
 0x125   : > { %v2288_v62 = vpop.xlane.xlu0 %854 }
 0x126   : > { %v1337_v63 = vsel %vm1336_vm3, %v1335_v61, %v1333_v53  ;;  %370 = vrot.lane.b32.xlu0 %v2284_v58, %s1955_s23  ;;  %v1355_v61 = vperm.slane %v2288_v62, %v2266_v47 }
 0x128   : > { %917 = vadd.xlane.f32.xlu2 %v916_v0 }
 0x12b   : > { %v825_v5 = vpop.xlane.xlu2 %824 }
 0x12c   : > { %v1338_v18 = vperm.slane %v825_v5, %v2246_v34  ;;  %v970_v5 = vsel %vm316_vm0, %v736_v55, 0.0 }
 0x12d   : > { %v858_v9 = vpop.xlane.xlu0 %857 }
 0x12e   : > { %372 = vrot.lane.b32.xlu0 %v2301_v7, %s1955_s23  ;;  %v1357_v2 = vperm.slane %v858_v9, %v2281_v57 }
 0x130   : > { %v840_v12 = vpop.xlane.xlu1 %839  ;;  %944 = vadd.xlane.f32.xlu2 %v943_v11 }
 0x131   : > { %v1346_v22 = vperm.slane %v840_v12, %v2252_v36 }
 0x133   : > { %v828_v14 = vpop.xlane.xlu2 %827  ;;  %v1347_v33 = vsel %vm1328_vm1, %v1346_v22, %v1345_v31 }
 0x134   : > { %v1339_v19 = vperm.slane %v828_v14, %v2252_v36 }
 0x135   : > { %v2317_v21 = vpop.xlane.xlu0 %875 }
 0x136   : > { %v1340_v23 = vsel %vm1328_vm1, %v1339_v19, %v1338_v18  ;;  %v731_v18 = vmul.f32 %v2323_v26, %v511_v15 }
 0x138   : > { %911 = vadd.xlane.f32.xlu1 %v910_v24  ;;  %v843_v28 = vpop.xlane.xlu1 %842  ;;  %950 = vadd.xlane.f32.xlu2 %v949_v25  ;;  %v955_v29 = vsel %vm316_vm0, %v731_v18, 0.0 }
 0x139   : > { %v1348_v32 = vperm.slane %v843_v28, %v2266_v47 }
 0x13b   : > { %v1349_v35 = vsel %vm1332_vm2, %v1348_v32, %v1347_v33  ;;  %v831_v37 = vpop.xlane.xlu2 %830  ;;  %v510_v33 = vld [vmem:[%s3236_s6 + $0x178] sm:$0xff] }
 0x13c   : > { %v1341_v40 = vperm.slane %v831_v37, %v2266_v47 }
 0x13d   : > { %v885_v42 = vpop.xlane.xlu0 %884 }
 0x13e   : > { %v1342_v44 = vsel %vm1332_vm2, %v1341_v40, %v1340_v23 }
 0x13f   : > { %v1344_v46 = vsel %vm1336_vm3, %v1343_v41, %v1342_v44  ;;  %v730_v44 = vmul.f32 %v2228_v20, %v510_v33  ;;  %v1924_v20 = vpack.i.bf16 %v2284_v58, %v2301_v7 }
 0x140   : > { %938 = vadd.xlane.f32.xlu1 %v937_v48  ;;  %v861_v49 = vpop.xlane.xlu1 %860  ;;  %959 = vadd.xlane.f32.xlu2 %v958_v45  ;;  %v1556_v53 = vsel %vm1555_vm4, %v1344_v46, %v1337_v63  ;;  %v1367_v46 = vperm.slane %v2317_v21, %v2252_v36  ;;  %v515_v21 = vld [vmem:[%s3236_s6 + $0x1a0] sm:$0xff] }
 0x141   : > { %v1359_v19 = vperm.slane %v861_v49, %v2246_v34  ;;  %v735_v55 = vmul.f32 %v2346_v3, %v515_v21  ;;  %v535_v21 = vld [vmem:[%s3236_s6 + $0x240] sm:$0xff] }
 0x143   : > { %v849_v54 = vpop.xlane.xlu2 %848 }
 0x144   : > { %v1352_v60 = vperm.slane %v849_v54, %v2246_v34 }
 0x145   : > { %v891_v0 = vpop.xlane.xlu0 %890 }
 0x146   : > { %v1354_v4 = vsel %vm1328_vm1, %v1353_v59, %v1352_v60  ;;  %v1376_v38 = vperm.slane %v891_v0, %v2266_v47  ;;  %v967_v60 = vsel %vm316_vm0, %v735_v55, 0.0 }
 0x147   : > { %v1356_v63 = vsel %vm1332_vm2, %v1355_v61, %v1354_v4 }
 0x148   : > { %v1358_v11 = vsel %vm1336_vm3, %v1357_v2, %v1356_v63  ;;  %971 = vadd.xlane.f32.xlu1 %v970_v5  ;;  %v867_v51 = vpop.xlane.xlu1 %866  ;;  %962 = vadd.xlane.f32.xlu2 %v961_v6  ;;  %v514_v2 = vld [vmem:[%s3236_s6 + $0x198] sm:$0xff]  ;;  %v603_v5 = vrot.slane %v2146_v27, 6 }
 0x149   : > { %v1362_v23 = vperm.slane %v867_v51, %v2266_v47  ;;  %v734_v63 = vmul.f32 %v2323_v26, %v514_v2  ;;  %v605_v2 = vrot.slane %v2284_v58, 1 }
 0x14b   : > { %v846_v12 = vpop.xlane.xlu2 %845 }
 0x14c   : > { %v1350_v62 = vperm.slane %v846_v12, %v2281_v57  ;;  %v964_v12 = vsel %vm316_vm0, %v734_v63, 0.0 }
 0x14d   : > { %v894_v13 = vpop.xlane.xlu0 %893 }
 0x14e   : > { %v1351_v9 = vsel %vm1336_vm3, %v1350_v62, %v1349_v35  ;;  %v1373_v35 = vperm.slane %v885_v42, %v2246_v34  ;;  %v1378_v39 = vperm.slane %v894_v13, %v2281_v57  ;;  %v2429_v62 = vperm.slane %v603_v5, 0  ;;  %v519_v13 = vld [vmem:[%s3236_s6 + $0x1c0] sm:$0xff] }
 0x14f   : > { %v1558_v52 = vsel %vm1557_vm5, %v1351_v9, %v1556_v53  ;;  %v952_v53 = vsel %vm316_vm0, %v730_v44, 0.0  ;;  %v517_v44 = vld [vmem:[%s3236_s6 + $0x1b0] sm:$0xff] }
 0x150   : > { %v1560_v14 = vsel %vm1559_vm6, %v1358_v11, %v1558_v52  ;;  %v870_v8 = vpop.xlane.xlu1 %869 }
 0x151   : > { %v1364_v25 = vperm.slane %v870_v8, %v2281_v57  ;;  %v739_v8 = vmul.f32 %v2429_v62, %v519_v13 }
 0x153   : > { %v864_v17 = vpop.xlane.xlu2 %863 }
 0x154   : > { %v1360_v22 = vperm.slane %v864_v17, %v2252_v36 }
 0x155   : > { %v2379_v24 = vpop.xlane.xlu0 %908 }
 0x156   : > { %v1361_v31 = vsel %vm1328_vm1, %v1360_v22, %v1359_v19  ;;  %v979_v22 = vsel %vm316_vm0, %v739_v8, 0.0 }
 0x157   : > { %v1363_v28 = vsel %vm1332_vm2, %v1362_v23, %v1361_v31 }
 0x158   : > { %v1365_v30 = vsel %vm1336_vm3, %v1364_v25, %v1363_v28  ;;  %v888_v32 = vpop.xlane.xlu1 %887  ;;  %956 = vadd.xlane.f32.xlu0 %v955_v29  ;;  %v518_v25 = vld [vmem:[%s3236_s6 + $0x1b8] sm:$0xff]  ;;  %v604_v29 = vrot.slane %v2146_v27, 7 }
 0x159   : > { %v1374_v37 = vperm.slane %v888_v32, %v2252_v36  ;;  %v1562_v16 = vsel %vm1561_vm7, %v1365_v30, %v1560_v14  ;;  %v738_v28 = vmul.f32 %v2346_v3, %v518_v25  ;;  %v607_v25 = vrot.slane %v2284_v58, 3 }
 0x15b   : > { %v1375_v40 = vsel %vm1328_vm1, %v1374_v37, %v1373_v35  ;;  %v873_v41 = vpop.xlane.xlu2 %872  ;;  %v976_v35 = vsel %vm316_vm0, %v738_v28, 0.0  ;;  %v2452_v37 = vperm.slane %v604_v29, 0 }
 0x15c   : > { %v1377_v48 = vsel %vm1332_vm2, %v1376_v38, %v1375_v40  ;;  %v1366_v42 = vperm.slane %v873_v41, %v2246_v34  ;;  %v524_v38 = vld [vmem:[%s3236_s6 + $0x1e8] sm:$0xff] }
 0x15d   : > { %v1379_v45 = vsel %vm1336_vm3, %v1378_v39, %v1377_v48  ;;  %v2402_v50 = vpop.xlane.xlu0 %923  ;;  %v523_v39 = vld [vmem:[%s3236_s6 + $0x1e0] sm:$0xff]  ;;  %v744_v41 = vmul.f32 %v2452_v37, %v524_v38  ;;  %v606_v48 = vrot.slane %v2284_v58, 2 }
 0x15e   : > { %v1368_v49 = vsel %vm1328_vm1, %v1367_v46, %v1366_v42  ;;  %v743_v46 = vmul.f32 %v2452_v37, %v523_v39 }
 0x160   : > { %953 = vadd.xlane.f32.xlu0 %v952_v53  ;;  %1920 = vrot.lane.b32.xlu2 %v1919_v43, %s1956_s11  ;;  %v897_v61 = vpop.xlane.xlu1 %896  ;;  %v991_v43 = vsel %vm316_vm0, %v743_v46, 0.0  ;;  %v525_v53 = vld [vmem:[%s3236_s6 + $0x1f0] sm:$0xff] }
 0x161   : > { %1925 = vrot.lane.b32.xlu1 %v1924_v20, %s1956_s11  ;;  %v1380_v15 = vperm.slane %v897_v61, %v2246_v34  ;;  %v2479_v20 = vperm.slane %v606_v48, 0  ;;  %v745_v55 = vmul.f32 %v2452_v37, %v525_v53  ;;  %v529_v53 = vld [vmem:[%s3236_s6 + $0x210] sm:$0xff] }
 0x163   : > { %v879_v54 = vpop.xlane.xlu2 %878  ;;  %v755_v61 = vmul.f32 %v2479_v20, %v535_v21  ;;  %v541_v21 = vld [vmem:[%s3236_s6 + $0x270] sm:$0xff] }
 0x164   : > { %v1369_v56 = vperm.slane %v879_v54, %v2266_v47 }
 0x165   : > { %v2418_v0 = vpop.xlane.xlu0 %926 }
 0x166   : > { %v1370_v59 = vsel %vm1332_vm2, %v1369_v56, %v1368_v49  ;;  %v994_v49 = vsel %vm316_vm0, %v744_v41, 0.0  ;;  %v520_v56 = vld [vmem:[%s3236_s6 + $0x1c8] sm:$0xff] }
 0x168   : > { %968 = vadd.xlane.f32.xlu0 %v967_v60  ;;  %v903_v9 = vpop.xlane.xlu1 %902 }
 0x169   : > { %v1383_v18 = vperm.slane %v903_v9, %v2266_v47  ;;  %v2513_v9 = vperm.slane %v605_v2, 0 }
 0x16b   : > { %v882_v4 = vpop.xlane.xlu2 %881 }
 0x16c   : > { %v1371_v6 = vperm.slane %v882_v4, %v2281_v57  ;;  %v1397_v4 = vperm.slane %v2418_v0, %v2266_v47  ;;  %v1027_v0 = vsel %vm316_vm0, %v755_v61, 0.0 }
 0x16d   : > { %v2435_v52 = vpop.xlane.xlu0 %935 }
 0x16e   : > { %v1372_v11 = vsel %vm1336_vm3, %v1371_v6, %v1370_v59  ;;  %v1395_v59 = vperm.slane %v2402_v50, %v2252_v36  ;;  %v740_v6 = vmul.f32 %v2429_v62, %v520_v56  ;;  %v2502_v50 = vperm.slane %v2284_v58, 0  ;;  %v526_v56 = vld [vmem:[%s3236_s6 + $0x1f8] sm:$0xff] }
 0x16f   : > { %v1564_v51 = vsel %vm1563_vm8, %v1372_v11, %v1562_v16 }
 0x170   : > { %965 = vadd.xlane.f32.xlu0 %v964_v12  ;;  %v1566_v26 = vsel %vm1565_vm9, %v1379_v45, %v1564_v51  ;;  %v737_v45 = vmul.f32 %v2346_v3, %v517_v44  ;;  %v997_v51 = vsel %vm316_vm0, %v745_v55, 0.0  ;;  %v982_v8 = vsel %vm316_vm0, %v740_v6, 0.0  ;;  %v522_v44 = vld [vmem:[%s3236_s6 + $0x1d8] sm:$0xff]  ;;  %v536_v6 = vld [vmem:[%s3236_s6 + $0x248] sm:$0xff] }
 0x171   : > { %v742_v48 = vmul.f32 %v2429_v62, %v522_v44  ;;  %v749_v55 = vmul.f32 %v2502_v50, %v529_v53  ;;  %v608_v44 = vrot.slane %v2284_v58, 4 }
 0x172   : > { %v973_v54 = vsel %vm316_vm0, %v737_v45, 0.0 }
 0x173   : > { %v900_v14 = vpop.xlane.xlu2 %899 }
 0x174   : > { %v1381_v17 = vperm.slane %v900_v14, %v2252_v36  ;;  %v534_v14 = vld [vmem:[%s3236_s6 + $0x238] sm:$0xff] }
 0x175   : > { %v930_v30 = vpop.xlane.xlu0 %929 }
 0x176   : > { %v1382_v19 = vsel %vm1328_vm1, %v1381_v17, %v1380_v15  ;;  %v1399_v63 = vperm.slane %v930_v30, %v2281_v57 }
 0x177   : > { %v1384_v23 = vsel %vm1332_vm2, %v1383_v18, %v1382_v19  ;;  %v521_v18 = vld [vmem:[%s3236_s6 + $0x1d0] sm:$0xff]  ;;  %v1402_v19 = vperm.slane %v2435_v52, %v2252_v36  ;;  %v531_v52 = vld [vmem:[%s3236_s6 + $0x220] sm:$0xff] }
 0x178   : > { %980 = vadd.xlane.f32.xlu0 %v979_v22  ;;  %v741_v28 = vmul.f32 %v2429_v62, %v521_v18  ;;  %v751_v41 = vmul.f32 %v2513_v9, %v531_v52  ;;  %v548_v52 = vld [vmem:[%s3236_s6 + $0x2a8] sm:$0xff] }
 0x17a   : > { %v985_v38 = vsel %vm316_vm0, %v741_v28, 0.0  ;;  %v1015_v45 = vsel %vm316_vm0, %v751_v41, 0.0  ;;  %v532_v41 = vld [vmem:[%s3236_s6 + $0x228] sm:$0xff] }
 0x17b   : > { %v906_v31 = vpop.xlane.xlu2 %905 }
 0x17c   : > { %v1385_v32 = vperm.slane %v906_v31, %v2281_v57 }
 0x17d   : > { %v2471_v42 = vpop.xlane.xlu0 %947 }
 0x17e   : > { %v1386_v33 = vsel %vm1336_vm3, %v1385_v32, %v1384_v23  ;;  %v754_v23 = vmul.f32 %v2513_v9, %v534_v14  ;;  %v609_v14 = vrot.slane %v2284_v58, 5 }
 0x17f   : > { %v2455_v16 = vsel %vm1567_vm10, %v1386_v33, %v1566_v26  ;;  %v527_v26 = vld [vmem:[%s3236_s6 + $0x200] sm:$0xff]  ;;  %v2537_v33 = vperm.slane %v607_v25, 0 }
 0x180   : > { %977 = vadd.xlane.f32.xlu0 %v976_v35  ;;  %v747_v17 = vmul.f32 %v2502_v50, %v527_v26  ;;  %v1024_v32 = vsel %vm316_vm0, %v754_v23, 0.0  ;;  %v540_v35 = vld [vmem:[%s3236_s6 + $0x268] sm:$0xff]  ;;  %v369_v62 = vpop.permute.xlu1 %368 }
 0x181   : > { %v760_v46 = vmul.f32 %v2537_v33, %v540_v35  ;;  %v761_v61 = vmul.f32 %v2537_v33, %v541_v21  ;;  %v528_v26 = vld [vmem:[%s3236_s6 + $0x208] sm:$0xff] }
 0x182   : > { %v1003_v29 = vsel %vm316_vm0, %v747_v17, 0.0 }
 0x183   : > { %v2463_v40 = vpop.xlane.xlu2 %914 }
 0x185   : > { %v2504_v12 = vpop.xlane.xlu0 %941 }
 0x188   : > { %995 = vadd.xlane.f32.xlu0 %v994_v49 }
 0x189   : > { %992 = vadd.xlane.f32.xlu2 %v991_v43  ;;  %v1042_v43 = vsel %vm316_vm0, %v760_v46, 0.0 }
 0x18b   : > { %974 = vadd.xlane.f32.xlu1 %v973_v54  ;;  %v921_v3 = vpop.xlane.xlu2 %920  ;;  %v988_v54 = vsel %vm316_vm0, %v742_v48, 0.0 }
 0x18c   : > { %v1394_v60 = vperm.slane %v921_v3, %v2246_v34 }
 0x18e   : > { %v1396_v5 = vsel %vm1328_vm1, %v1395_v59, %v1394_v60  ;;  %v1409_v59 = vperm.slane %v2471_v42, %v2252_v36  ;;  %v542_v42 = vld [vmem:[%s3236_s6 + $0x278] sm:$0xff] }
 0x18f   : > { %v1398_v11 = vsel %vm1332_vm2, %v1397_v4, %v1396_v5  ;;  %v746_v4 = vmul.f32 %v2452_v37, %v526_v56  ;;  %v1045_v5 = vsel %vm316_vm0, %v761_v61, 0.0  ;;  %v762_v18 = vmul.f32 %v2537_v33, %v542_v42 }
 0x190   : > { %v2507_v13 = vsel %vm1336_vm3, %v1399_v63, %v1398_v11  ;;  %998 = vadd.xlane.f32.xlu0 %v997_v51  ;;  %v1009_v63 = vsel %vm316_vm0, %v749_v55, 0.0  ;;  %v551_v55 = vld [vmem:[%s3236_s6 + $0x2c0] sm:$0xff] }
 0x191   : > { %1028 = vadd.xlane.f32.xlu2 %v1027_v0  ;;  %v1000_v11 = vsel %vm316_vm0, %v746_v4, 0.0  ;;  %v756_v0 = vmul.f32 %v2479_v20, %v536_v6  ;;  %v553_v6 = vld [vmem:[%s3236_s6 + $0x2d0] sm:$0xff] }
 0x193   : > { %983 = vadd.xlane.f32.xlu1 %v982_v8  ;;  %v933_v15 = vpop.xlane.xlu2 %932  ;;  %v1387_v8 = vperm.slane %v2379_v24, %v2246_v34  ;;  %v748_v24 = vmul.f32 %v2502_v50, %v528_v26 }
 0x194   : > { %v1401_v22 = vperm.slane %v933_v15, %v2246_v34 }
 0x196   : > { %v2529_v31 = vsel %vm1328_vm1, %v1402_v19, %v1401_v22  ;;  %v1390_v19 = vperm.slane %v2463_v40, %v2266_v47  ;;  %v537_v40 = vld [vmem:[%s3236_s6 + $0x250] sm:$0xff] }
 0x198   : > { %1004 = vadd.xlane.f32.xlu0 %v1003_v29  ;;  %v371_v30 = vpop.permute.xlu0 %370  ;;  %v1030_v29 = vsel %vm316_vm0, %v756_v0, 0.0 }
 0x199   : > { %1025 = vadd.xlane.f32.xlu2 %v1024_v32  ;;  %v2609_v32 = vperm.slane %v609_v14, 0  ;;  %v546_v14 = vld [vmem:[%s3236_s6 + $0x298] sm:$0xff] }
 0x19b   : > { %986 = vadd.xlane.f32.xlu1 %v985_v38  ;;  %v918_v39 = vpop.xlane.xlu2 %917  ;;  %v1006_v38 = vsel %vm316_vm0, %v748_v24, 0.0  ;;  %v768_v48 = vmul.f32 %v2609_v32, %v548_v52 }
 0x19c   : > { %v1392_v22 = vperm.slane %v918_v39, %v2281_v57  ;;  %v757_v39 = vmul.f32 %v2479_v20, %v537_v40 }
 0x19e   : > { %v1033_v21 = vsel %vm316_vm0, %v757_v39, 0.0 }
 0x1a0   : > { %1016 = vadd.xlane.f32.xlu0 %v1015_v45  ;;  %v373_v49 = vpop.permute.xlu0 %372  ;;  %v610_v45 = vrot.slane %v2284_v58, 6 }
 0x1a1   : > { %1882 = vmatpush.xpose.msk.msra.mxu1 %vm316_vm0, %v373_v49  ;;  %1043 = vadd.xlane.f32.xlu2 %v1042_v43  ;;  %v752_v43 = vmul.f32 %v2513_v9, %v532_v41 }
 0x1a3   : > { %989 = vadd.xlane.f32.xlu1 %v988_v54  ;;  %v945_v3 = vpop.xlane.xlu2 %944  ;;  %v2632_v54 = vperm.slane %v608_v44, 0  ;;  %v1018_v56 = vsel %vm316_vm0, %v752_v43, 0.0 }
 0x1a4   : > { %v1408_v60 = vperm.slane %v945_v3, %v2246_v34  ;;  %v641_v3 = vperm.slane %v610_v45, 0  ;;  %v611_v45 = vrot.slane %v2284_v58, 7 }
 0x1a5   : > { %1883 = vmatpush.xpose.msk.msra.mxu1 %vm316_vm0, %v371_v30 }
 0x1a6   : > { %v1410_v2 = vsel %vm1328_vm1, %v1409_v59, %v1408_v60  ;;  %v533_v59 = vld [vmem:[%s3236_s6 + $0x230] sm:$0xff]  ;;  %v771_v60 = vmul.f32 %v641_v3, %v551_v55 }
 0x1a7   : > { %v753_v61 = vmul.f32 %v2513_v9, %v533_v59 }
 0x1a8   : > { %1010 = vadd.xlane.f32.xlu0 %v1009_v63  ;;  %v1075_v63 = vsel %vm316_vm0, %v771_v60, 0.0 }
 0x1a9   : > { %1884 = vmatpush.xpose.msk.msra.mxu1 %vm316_vm0, %v369_v62  ;;  %1046 = vadd.xlane.f32.xlu2 %v1045_v5  ;;  %v1066_v62 = vsel %vm316_vm0, %v768_v48, 0.0  ;;  %v545_v5 = vld [vmem:[%s3236_s6 + $0x290] sm:$0xff]  ;;  %v1021_v9 = vsel %vm316_vm0, %v753_v61, 0.0  ;;  %v538_v48 = vld [vmem:[%s3236_s6 + $0x258] sm:$0xff] }
 0x1aa   : > { %v765_v42 = vmul.f32 %v2632_v54, %v545_v5 }
 0x1ab   : > { %1001 = vadd.xlane.f32.xlu1 %v1000_v11  ;;  %v912_v37 = vpop.xlane.xlu1 %911  ;;  %v951_v51 = vpop.xlane.xlu2 %950  ;;  %v530_v11 = vld [vmem:[%s3236_s6 + $0x218] sm:$0xff] }
 0x1ac   : > { %v1388_v15 = vperm.slane %v912_v37, %v2252_v36  ;;  %v1411_v17 = vperm.slane %v951_v51, %v2266_v47  ;;  %v773_v37 = vmul.f32 %v641_v3, %v553_v6  ;;  %v750_v51 = vmul.f32 %v2502_v50, %v530_v11 }
 0x1ad   : > { %1885 = vmatpush.xpose.msk.msra.mxu1 %vm316_vm0, %v2294_v1  ;;  %v1048_v1 = vsel %vm316_vm0, %v762_v18, 0.0  ;;  %v1057_v0 = vsel %vm316_vm0, %v765_v42, 0.0  ;;  %v613_v42 = vrot.slane %v2301_v7, 2 }
 0x1ae   : > { %v1389_v23 = vsel %vm1328_vm1, %v1388_v15, %v1387_v8  ;;  %v2597_v25 = vsel %vm1332_vm2, %v1411_v17, %v1410_v2  ;;  %v1081_v26 = vsel %vm316_vm0, %v773_v37, 0.0  ;;  %v554_v8 = vld [vmem:[%s3236_s6 + $0x2d8] sm:$0xff]  ;;  %v1012_v50 = vsel %vm316_vm0, %v750_v51, 0.0 }
 0x1af   : > { %v1391_v28 = vsel %vm1332_vm2, %v1390_v19, %v1389_v23  ;;  %v766_v19 = vmul.f32 %v2632_v54, %v546_v14  ;;  %v2743_v14 = vperm.slane %v613_v42, 0 }
 0x1b0   : > { %v1393_v30 = vsel %vm1336_vm3, %v1392_v22, %v1391_v28  ;;  %1031 = vadd.xlane.f32.xlu0 %v1030_v29  ;;  %1886 = vmatmul.msk.f32.vlgmr.msra.gmra.mxu1 %vm316_vm0, %v2039_v10  ;;  %v539_v22 = vld [vmem:[%s3236_s6 + $0x260] sm:$0xff]  ;;  %v774_v28 = vmul.f32 %v641_v3, %v554_v8 }
 0x1b1   : > { %1049 = vadd.xlane.f32.xlu2 %v1048_v1  ;;  %v1569_v35 = vsel %vm1555_vm4, %v2507_v13, %v1393_v30  ;;  %v1406_v13 = vperm.slane %v2504_v12, %v2281_v57  ;;  %v543_v12 = vld [vmem:[%s3236_s6 + $0x280] sm:$0xff]  ;;  %v759_v1 = vmul.f32 %v2537_v33, %v539_v22  ;;  %v1060_v40 = vsel %vm316_vm0, %v766_v19, 0.0 }
 0x1b2   : > { %v559_v33 = vld [vmem:[%s3236_s6 + $0x300] sm:$0xff] }
 0x1b3   : > { %1007 = vadd.xlane.f32.xlu1 %v1006_v38  ;;  %v939_v10 = vpop.xlane.xlu1 %938  ;;  %v960_v4 = vpop.xlane.xlu2 %959  ;;  %v552_v38 = vld [vmem:[%s3236_s6 + $0x2c8] sm:$0xff]  ;;  %v1039_v39 = vsel %vm316_vm0, %v759_v1, 0.0  ;;  %v567_v8 = vld [vmem:[%s3236_s6 + $0x340] sm:$0xff] }
 0x1b4   : > { %v1404_v46 = vperm.slane %v939_v10, %v2266_v47  ;;  %v1416_v23 = vperm.slane %v960_v4, %v2252_v36  ;;  %v2697_v10 = vperm.slane %v2301_v7, 0  ;;  %v787_v19 = vmul.f32 %v2743_v14, %v567_v8 }
 0x1b6   : > { %v1405_v49 = vsel %vm1332_vm2, %v1404_v46, %v2529_v31  ;;  %v772_v46 = vmul.f32 %v641_v3, %v552_v38  ;;  %v779_v43 = vmul.f32 %v2697_v10, %v559_v33  ;;  %v758_v3 = vmul.f32 %v2479_v20, %v538_v48  ;;  %v564_v20 = vld [vmem:[%s3236_s6 + $0x328] sm:$0xff]  ;;  %v550_v48 = vld [vmem:[%s3236_s6 + $0x2b8] sm:$0xff] }
 0x1b7   : > { %v1407_v53 = vsel %vm1336_vm3, %v1406_v13, %v1405_v49 }
 0x1b8   : > { %1034 = vadd.xlane.f32.xlu0 %v1033_v21  ;;  %1887 = vmatmul.msk.f32.gmra.mxu1 %vm316_vm0, %v2146_v27  ;;  %v2641_v31 = vsel %vm1557_vm5, %v1407_v53, %v1569_v35  ;;  %v763_v27 = vmul.f32 %v2632_v54, %v543_v12  ;;  %v1084_v35 = vsel %vm316_vm0, %v774_v28, 0.0  ;;  %v612_v53 = vrot.slane %v2301_v7, 1 }
 0x1b9   : > { %1067 = vadd.xlane.f32.xlu2 %v1066_v62 }
 0x1ba   : > { %v1051_v2 = vsel %vm316_vm0, %v763_v27, 0.0  ;;  %v1099_v27 = vsel %vm316_vm0, %v779_v43, 0.0  ;;  %v2722_v60 = vperm.slane %v612_v53, 0 }
 0x1bb   : > { %1019 = vadd.xlane.f32.xlu1 %v1018_v56  ;;  %v963_v15 = vpop.xlane.xlu2 %962  ;;  %v972_v17 = vpop.xlane.xlu1 %971  ;;  %v2716_v56 = vperm.slane %v611_v45, 0  ;;  %v770_v45 = vmul.f32 %v2609_v32, %v550_v48 }
 0x1bc   : > { %v1418_v29 = vperm.slane %v963_v15, %v2266_v47  ;;  %v1423_v5 = vperm.slane %v972_v17, %v2252_v36  ;;  %v547_v17 = vld [vmem:[%s3236_s6 + $0x2a0] sm:$0xff] }
 0x1bd   : > { %v1072_v43 = vsel %vm316_vm0, %v770_v45, 0.0 }
 0x1c0   : > { %1052 = vadd.xlane.f32.xlu0 %v1051_v2  ;;  %1888 = vmatmul.msk.f32.gmra.mxu1 %vm316_vm0, %v2284_v58  ;;  %v1078_v58 = vsel %vm316_vm0, %v772_v46, 0.0 }
 0x1c1   : > { %1076 = vadd.xlane.f32.xlu2 %v1075_v63  ;;  %v544_v63 = vld [vmem:[%s3236_s6 + $0x288] sm:$0xff] }
 0x1c2   : > { %v764_v37 = vmul.f32 %v2632_v54, %v544_v63 }
 0x1c3   : > { %1022 = vadd.xlane.f32.xlu1 %v1021_v9  ;;  %v1921_v21 = vpop.permute.xlu2 %1920  ;;  %v784_v9 = vmul.f32 %v2722_v60, %v564_v20 }
 0x1c4   : > { %v1922_v59 = vunpack.i.l.bf16 %v1921_v21  ;;  %v1923_v61 = vunpack.i.h.bf16 %v1921_v21  ;;  %v1054_v15 = vsel %vm316_vm0, %v764_v37, 0.0 }
 0x1c8   : > { %1058 = vadd.xlane.f32.xlu0 %v1057_v0  ;;  %1889 = vmatmul.msk.f32.gmra.mxu1 %vm316_vm0, %v2301_v7  ;;  %v1114_v0 = vsel %vm316_vm0, %v784_v9, 0.0 }
 0x1c9   : > { %1082 = vadd.xlane.f32.xlu2 %v1081_v26  ;;  %v557_v26 = vld [vmem:[%s3236_s6 + $0x2f0] sm:$0xff] }
 0x1cb   : > { %1013 = vadd.xlane.f32.xlu1 %v1012_v50  ;;  %v957_v18 = vpop.xlane.xlu0 %956  ;;  %v777_v50 = vmul.f32 %v2716_v56, %v557_v26 }
 0x1cc   : > { %v1415_v24 = vperm.slane %v957_v18, %v2246_v34 }
 0x1cd   : > { %v1093_v28 = vsel %vm316_vm0, %v777_v50, 0.0 }
 0x1ce   : > { %v1417_v30 = vsel %vm1328_vm1, %v1416_v23, %v1415_v24  ;;  %v767_v23 = vmul.f32 %v2609_v32, %v547_v17 }
 0x1cf   : > { %v2690_v52 = vsel %vm1332_vm2, %v1418_v29, %v1417_v30  ;;  %v1123_v29 = vsel %vm316_vm0, %v787_v19, 0.0  ;;  %v560_v30 = vld [vmem:[%s3236_s6 + $0x308] sm:$0xff] }
 0x1d0   : > { %1061 = vadd.xlane.f32.xlu0 %v1060_v40  ;;  %v1063_v1 = vsel %vm316_vm0, %v767_v23, 0.0 }
 0x1d1   : > { %1085 = vadd.xlane.f32.xlu2 %v1084_v35  ;;  %v549_v35 = vld [vmem:[%s3236_s6 + $0x2b0] sm:$0xff] }
 0x1d2   : > { %v769_v38 = vmul.f32 %v2609_v32, %v549_v35 }
 0x1d3   : > { %1040 = vadd.xlane.f32.xlu1 %v1039_v39  ;;  %v1926_v41 = vpop.permute.xlu1 %1925  ;;  %v954_v44 = vpop.xlane.xlu0 %953  ;;  %v561_v39 = vld [vmem:[%s3236_s6 + $0x310] sm:$0xff] }
 0x1d4   : > { %v1413_v13 = vperm.slane %v954_v44, %v2281_v57  ;;  %v1927_v49 = vunpack.i.l.bf16 %v1926_v41  ;;  %v1928_v12 = vunpack.i.h.bf16 %v1926_v41  ;;  %v1069_v41 = vsel %vm316_vm0, %v769_v38, 0.0 }
 0x1d5   : > { %v781_v46 = vmul.f32 %v2697_v10, %v561_v39 }
 0x1d6   : > { %v1414_v62 = vsel %vm1336_vm3, %v1413_v13, %v2597_v25  ;;  %1634 = vmatpush.msra.mxu2 %v1927_v49  ;;  %v555_v25 = vld [vmem:[%s3236_s6 + $0x2e0] sm:$0xff]  ;;  %v568_v49 = vld [vmem:[%s3236_s6 + $0x348] sm:$0xff] }
 0x1d7   : > { %v1571_v55 = vsel %vm1559_vm6, %v1414_v62, %v2641_v31  ;;  %v1036_v31 = vsel %vm316_vm0, %v758_v3, 0.0  ;;  %v775_v4 = vmul.f32 %v2716_v56, %v555_v25  ;;  %v1105_v13 = vsel %vm316_vm0, %v781_v46, 0.0  ;;  %v556_v62 = vld [vmem:[%s3236_s6 + $0x2e8] sm:$0xff] }
 0x1d8   : > { %1635 = vmatpush.msra.mxu2 %v1928_v12  ;;  %1079 = vadd.xlane.f32.xlu0 %v1078_v58  ;;  %v788_v21 = vmul.f32 %v2743_v14, %v568_v49  ;;  %v776_v58 = vmul.f32 %v2716_v56, %v556_v62 }
 0x1d9   : > { %1100 = vadd.xlane.f32.xlu2 %v1099_v27  ;;  %v1087_v51 = vsel %vm316_vm0, %v775_v4, 0.0 }
 0x1da   : > { %1636 = vmatpush.msra.mxu2 %v1922_v59  ;;  %v1126_v25 = vsel %vm316_vm0, %v788_v21, 0.0  ;;  %v1090_v4 = vsel %vm316_vm0, %v776_v58, 0.0 }
 0x1db   : > { %1037 = vadd.xlane.f32.xlu1 %v1036_v31  ;;  %v969_v2 = vpop.xlane.xlu0 %968  ;;  %v569_v31 = vld [vmem:[%s3236_s6 + $0x350] sm:$0xff] }
 0x1dc   : > { %v1422_v6 = vperm.slane %v969_v2, %v2246_v34  ;;  %1637 = vmatpush.msra.mxu2 %v1923_v61 }
 0x1de   : > { %v1424_v11 = vsel %vm1328_vm1, %v1423_v5, %v1422_v6  ;;  %v789_v5 = vmul.f32 %v2743_v14, %v569_v31  ;;  %v558_v6 = vld [vmem:[%s3236_s6 + $0x2f8] sm:$0xff] }
 0x1e0   : > { %1088 = vadd.xlane.f32.xlu0 %v1087_v51 }
 0x1e1   : > { %1115 = vadd.xlane.f32.xlu2 %v1114_v0  ;;  %v778_v0 = vmul.f32 %v2716_v56, %v558_v6 }
 0x1e3   : > { %1055 = vadd.xlane.f32.xlu1 %v1054_v15  ;;  %v966_v54 = vpop.xlane.xlu0 %965  ;;  %v1129_v15 = vsel %vm316_vm0, %v789_v5, 0.0  ;;  %v1096_v50 = vsel %vm316_vm0, %v778_v0, 0.0  ;;  %v358_v5 = vld [vmem:[%s3235_s5] sm:$0xff] }
 0x1e4   : > { %v1420_v18 = vperm.slane %v966_v54, %v2281_v57 }
 0x1e6   : > { %v1421_v22 = vsel %vm1336_vm3, %v1420_v18, %v2690_v52  ;;  %v780_v52 = vmul.f32 %v2697_v10, %v560_v30  ;;  %v563_v18 = vld [vmem:[%s3236_s6 + $0x320] sm:$0xff]  ;;  %v565_v30 = vld [vmem:[%s3236_s6 + $0x330] sm:$0xff] }
 0x1e7   : > { %v1572_v24 = vsel %vm1561_vm7, %v1421_v22, %v1571_v55  ;;  %v783_v22 = vmul.f32 %v2722_v60, %v563_v18 }
 0x1e8   : > { %1094 = vadd.xlane.f32.xlu0 %v1093_v28  ;;  %v1102_v33 = vsel %vm316_vm0, %v780_v52, 0.0  ;;  %v785_v52 = vmul.f32 %v2722_v60, %v565_v30  ;;  %v566_v30 = vld [vmem:[%s3236_s6 + $0x338] sm:$0xff] }
 0x1e9   : > { %1124 = vadd.xlane.f32.xlu2 %v1123_v29  ;;  %v1111_v28 = vsel %vm316_vm0, %v783_v22, 0.0 }
 0x1eb   : > { %1064 = vadd.xlane.f32.xlu1 %v1063_v1  ;;  %v981_v40 = vpop.xlane.xlu0 %980 }
 0x1ec   : > { %v1429_v26 = vperm.slane %v981_v40, %v2246_v34 }
 0x1f0   : > { %1103 = vadd.xlane.f32.xlu0 %v1102_v33  ;;  %v1117_v33 = vsel %vm316_vm0, %v785_v52, 0.0 }
 0x1f3   : > { %1070 = vadd.xlane.f32.xlu1 %v1069_v41  ;;  %v978_v44 = vpop.xlane.xlu0 %977 }
 0x1f4   : > { %v1427_v20 = vperm.slane %v978_v44, %v2281_v57  ;;  %v562_v44 = vld [vmem:[%s3236_s6 + $0x318] sm:$0xff] }
 0x1f5   : > { %v782_v45 = vmul.f32 %v2697_v10, %v562_v44 }
 0x1f8   : > { %1106 = vadd.xlane.f32.xlu0 %v1105_v13  ;;  %v614_v13 = vrot.slane %v2301_v7, 3 }
 0x1fa   : > { %v2844_v21 = vperm.slane %v614_v13, 0 }
 0x1fb   : > { %1073 = vadd.xlane.f32.xlu1 %v1072_v43  ;;  %v996_v53 = vpop.xlane.xlu0 %995 }
 0x1fc   : > { %v1437_v12 = vperm.slane %v996_v53, %v2252_v36  ;;  %v993_v32 = vpop.xlane.xlu2 %992  ;;  %v1108_v53 = vsel %vm316_vm0, %v782_v45, 0.0 }
 0x1fd   : > { %v1436_v3 = vperm.slane %v993_v32, %v2246_v34  ;;  %v571_v32 = vld [vmem:[%s3236_s6 + $0x360] sm:$0xff] }
 0x1fe   : > { %v975_v55 = vpop.xlane.xlu1 %974 }
 0x1ff   : > { %v1438_v27 = vsel %vm1328_vm1, %v1437_v12, %v1436_v3  ;;  %v1425_v59 = vperm.slane %v975_v55, %v2266_v47 }
 0x200   : > { %1127 = vadd.xlane.f32.xlu0 %v1126_v25 }
 0x201   : > { %v1426_v61 = vsel %vm1332_vm2, %v1425_v59, %v1424_v11  ;;  %v791_v59 = vmul.f32 %v2844_v21, %v571_v32 }
 0x202   : > { %v1428_v2 = vsel %vm1336_vm3, %v1427_v20, %v1426_v61 }
 0x203   : > { %1091 = vadd.xlane.f32.xlu1 %v1090_v4  ;;  %v999_v63 = vpop.xlane.xlu0 %998  ;;  %v1573_v9 = vsel %vm1563_vm8, %v1428_v2, %v1572_v24  ;;  %v1135_v2 = vsel %vm316_vm0, %v791_v59, 0.0 }
 0x204   : > { %v1439_v42 = vperm.slane %v999_v63, %v2266_v47  ;;  %v1029_v37 = vpop.xlane.xlu2 %1028 }
 0x205   : > { %v1457_v10 = vperm.slane %v1029_v37, %v2246_v34 }
 0x206   : > { %v1440_v51 = vsel %vm1332_vm2, %v1439_v42, %v1438_v27  ;;  %v984_v11 = vpop.xlane.xlu1 %983 }
 0x207   : > { %v1430_v8 = vperm.slane %v984_v11, %v2252_v36 }
 0x208   : > { %1130 = vadd.xlane.f32.xlu0 %v1129_v15 }
 0x209   : > { %v1431_v54 = vsel %vm1328_vm1, %v1430_v8, %v1429_v26 }
 0x20b   : > { %1097 = vadd.xlane.f32.xlu1 %v1096_v50  ;;  %v1005_v17 = vpop.xlane.xlu0 %1004  ;;  %v359_v50 = vld [vmem:[%s3235_s5 + $0x8] sm:$0xff] }
 0x20c   : > { %v2818_v19 = vpop.xlane.xlu2 %1025  ;;  %v1443_v25 = vperm.slane %v1005_v17, %v2246_v34 }
 0x20e   : > { %v987_v56 = vpop.xlane.xlu1 %986 }
 0x20f   : > { %v1432_v23 = vperm.slane %v987_v56, %v2266_v47 }
 0x211   : > { %v1433_v24 = vsel %vm1332_vm2, %v1432_v23, %v1431_v54 }
 0x213   : > { %1112 = vadd.xlane.f32.xlu1 %v1111_v28  ;;  %v1017_v29 = vpop.xlane.xlu0 %1016 }
 0x214   : > { %v2827_v1 = vpop.xlane.xlu2 %1043  ;;  %v1450_v0 = vperm.slane %v1017_v29, %v2246_v34 }
 0x216   : > { %v990_v40 = vpop.xlane.xlu1 %989 }
 0x217   : > { %v1434_v35 = vperm.slane %v990_v40, %v2281_v57 }
 0x219   : > { %v1435_v38 = vsel %vm1336_vm3, %v1434_v35, %v1433_v24  ;;  %v1455_v24 = vperm.slane %v2818_v19, %v2281_v57  ;;  %v360_v35 = vld [vmem:[%s3235_s5 + $0x10] sm:$0xff]  ;;  %v786_v19 = vmul.f32 %v2722_v60, %v566_v30  ;;  %v575_v60 = vld [vmem:[%s3236_s6 + $0x380] sm:$0xff] }
 0x21a   : > { %v1574_v39 = vsel %vm1565_vm9, %v1435_v38, %v1573_v9  ;;  %v615_v38 = vrot.slane %v2301_v7, 4 }
 0x21b   : > { %1118 = vadd.xlane.f32.xlu1 %v1117_v33  ;;  %v1011_v41 = vpop.xlane.xlu0 %1010  ;;  %v1120_v45 = vsel %vm316_vm0, %v786_v19, 0.0 }
 0x21c   : > { %v2837_v46 = vpop.xlane.xlu2 %1046  ;;  %v1446_v31 = vperm.slane %v1011_v41, %v2266_v47  ;;  %v647_v13 = vperm.slane %v615_v38, 0 }
 0x21e   : > { %v1002_v48 = vpop.xlane.xlu1 %1001 }
 0x21f   : > { %v1441_v49 = vperm.slane %v1002_v48, %v2281_v57 }
 0x221   : > { %v1442_v43 = vsel %vm1336_vm3, %v1441_v49, %v1440_v51 }
 0x222   : > { %v2847_v62 = vsel %vm1567_vm10, %v1442_v43, %v1574_v39 }
 0x223   : > { %1109 = vadd.xlane.f32.xlu1 %v1108_v53  ;;  %v1032_v12 = vpop.xlane.xlu0 %1031 }
 0x224   : > { %v1458_v3 = vperm.slane %v1032_v12, %v2252_v36  ;;  %v2854_v55 = vpop.xlane.xlu2 %1049  ;;  %v572_v12 = vld [vmem:[%s3236_s6 + $0x368] sm:$0xff] }
 0x226   : > { %v1459_v58 = vsel %vm1328_vm1, %v1458_v3, %v1457_v10  ;;  %v1008_v27 = vpop.xlane.xlu1 %1007  ;;  %v361_v10 = vld [vmem:[%s3235_s5 + $0x18] sm:$0xff]  ;;  %v795_v3 = vmul.f32 %v647_v13, %v575_v60 }
 0x227   : > { %v1444_v20 = vperm.slane %v1008_v27, %v2252_v36  ;;  %v792_v27 = vmul.f32 %v2844_v21, %v572_v12  ;;  %v617_v12 = vrot.slane %v2301_v7, 6 }
 0x229   : > { %v1445_v61 = vsel %vm1328_vm1, %v1444_v20, %v1443_v25  ;;  %v1465_v20 = vperm.slane %v2827_v1, %v2252_v36  ;;  %v570_v1 = vld [vmem:[%s3236_s6 + $0x358] sm:$0xff] }
 0x22a   : > { %v1447_v4 = vsel %vm1332_vm2, %v1446_v31, %v1445_v61  ;;  %v1467_v61 = vperm.slane %v2837_v46, %v2266_v47  ;;  %v577_v46 = vld [vmem:[%s3236_s6 + $0x390] sm:$0xff] }
 0x22b   : > { %1136 = vadd.xlane.f32.xlu1 %v1135_v2  ;;  %v1035_v63 = vpop.xlane.xlu0 %1034 }
 0x22c   : > { %v1460_v6 = vperm.slane %v1035_v63, %v2266_v47  ;;  %v2868_v9 = vpop.xlane.xlu2 %1067  ;;  %v1469_v63 = vperm.slane %v2854_v55, %v2281_v57  ;;  %v573_v55 = vld [vmem:[%s3236_s6 + $0x370] sm:$0xff] }
 0x22d   : > { %v407_v42 = vpop.f32.mrf.mxu1 }
 0x22e   : > { %v2871_v37 = vsel %vm1332_vm2, %v1460_v6, %v1459_v58  ;;  %v2873_v51 = vadd.f32 %v407_v42, %v358_v5  ;;  %v1020_v11 = vpop.xlane.xlu1 %1019  ;;  %v1138_v6 = vsel %vm316_vm0, %v792_v27, 0.0 }
 0x22f   : > { %v1451_v26 = vperm.slane %v1020_v11, %v2252_v36 }
 0x230   : > { %v419_v8 = vsel %vm316_vm0, %v2873_v51, -inf }
 0x231   : > { %v1452_v15 = vsel %vm1328_vm1, %v1451_v26, %v1450_v0  ;;  %420 = vmax.xlane.f32.xlu2 %v419_v8 }
 0x233   : > { %v2880_v54 = vpop.xlane.xlu0 %1052 }
 0x234   : > { %v1077_v22 = vpop.xlane.xlu2 %1076 }
 0x235   : > { %v410_v17 = vpop.f32.mrf.mxu1  ;;  %v1485_v8 = vperm.slane %v1077_v22, %v2246_v34 }
 0x236   : > { %v2885_v18 = vadd.f32 %v410_v17, %v359_v50  ;;  %v1023_v56 = vpop.xlane.xlu1 %1022  ;;  %v790_v50 = vmul.f32 %v2743_v14, %v570_v1  ;;  %v797_v17 = vmul.f32 %v647_v13, %v577_v46  ;;  %v618_v46 = vrot.slane %v2301_v7, 7 }
 0x237   : > { %v1453_v23 = vperm.slane %v1023_v56, %v2266_v47 }
 0x238   : > { %v422_v28 = vsel %vm316_vm0, %v2885_v18, -inf  ;;  %v1132_v22 = vsel %vm316_vm0, %v790_v50, 0.0  ;;  %v3018_v50 = vperm.slane %v618_v46, 0 }
 0x239   : > { %v1454_v29 = vsel %vm1332_vm2, %v1453_v23, %v1452_v15  ;;  %423 = vmax.xlane.f32.xlu2 %v422_v28  ;;  %v793_v23 = vmul.f32 %v2844_v21, %v573_v55 }
 0x23a   : > { %v1456_v40 = vsel %vm1336_vm3, %v1455_v24, %v1454_v29 }
 0x23b   : > { %v2897_v52 = vpop.xlane.xlu0 %1058  ;;  %v1141_v38 = vsel %vm316_vm0, %v793_v23, 0.0  ;;  %v587_v23 = vld [vmem:[%s3236_s6 + $0x3e0] sm:$0xff] }
 0x23c   : > { %v1083_v49 = vpop.xlane.xlu2 %1082 }
 0x23d   : > { %v413_v33 = vpop.f32.mrf.mxu1  ;;  %v1488_v56 = vperm.slane %v1083_v49, %v2266_v47  ;;  %v616_v49 = vrot.slane %v2301_v7, 5 }
 0x23e   : > { %v2904_v39 = vadd.f32 %v413_v33, %v360_v35  ;;  %v1014_v41 = vpop.xlane.xlu1 %1013  ;;  %v1153_v35 = vsel %vm316_vm0, %v797_v17, 0.0  ;;  %v576_v33 = vld [vmem:[%s3236_s6 + $0x388] sm:$0xff] }
 0x23f   : > { %v1448_v44 = vperm.slane %v1014_v41, %v2281_v57  ;;  %v578_v41 = vld [vmem:[%s3236_s6 + $0x398] sm:$0xff]  ;;  %v2985_v27 = vperm.slane %v616_v49, 0 }
 0x240   : > { %v425_v48 = vsel %vm316_vm0, %v2904_v39, -inf  ;;  %v798_v60 = vmul.f32 %v647_v13, %v578_v41 }
 0x241   : > { %v1449_v43 = vsel %vm1336_vm3, %v1448_v44, %v1447_v4  ;;  %426 = vmax.xlane.f32.xlu0 %v425_v48  ;;  %1121 = vadd.xlane.f32.xlu2 %v1120_v45  ;;  %v1147_v4 = vsel %vm316_vm0, %v795_v3, 0.0  ;;  %v574_v48 = vld [vmem:[%s3236_s6 + $0x378] sm:$0xff] }
 0x242   : > { %v1576_v53 = vsel %vm1555_vm4, %v1456_v40, %v1449_v43  ;;  %v796_v43 = vmul.f32 %v647_v13, %v576_v33  ;;  %v2991_v13 = vperm.slane %v617_v12, 0 }
 0x243   : > { %v2918_v32 = vpop.xlane.xlu0 %1061 }
 0x244   : > { %v1086_v11 = vpop.xlane.xlu2 %1085 }
 0x245   : > { %v416_v58 = vpop.f32.mrf.mxu1  ;;  %v1490_v24 = vperm.slane %v1086_v11, %v2281_v57 }
 0x246   : > { %v2924_v59 = vadd.f32 %v416_v58, %v361_v10  ;;  %v1041_v25 = vpop.xlane.xlu1 %1040  ;;  %v794_v10 = vmul.f32 %v2844_v21, %v574_v48  ;;  %v1476_v21 = vperm.slane %v2918_v32, %v2281_v57  ;;  %v580_v32 = vld [vmem:[%s3236_s6 + $0x3a8] sm:$0xff] }
 0x247   : > { %v1464_v31 = vperm.slane %v1041_v25, %v2246_v34  ;;  %v1474_v25 = vperm.slane %v2897_v52, %v2266_v47  ;;  %v584_v52 = vld [vmem:[%s3236_s6 + $0x3c8] sm:$0xff]  ;;  %v800_v55 = vmul.f32 %v2985_v27, %v580_v32 }
 0x248   : > { %v428_v2 = vsel %vm316_vm0, %v2924_v59, -inf  ;;  %v804_v1 = vmul.f32 %v2991_v13, %v584_v52 }
 0x249   : > { %v1466_v5 = vsel %vm1328_vm1, %v1465_v20, %v1464_v31  ;;  %429 = vmax.xlane.f32.xlu1 %v428_v2  ;;  %1148 = vadd.xlane.f32.xlu0 %v1147_v4  ;;  %v1150_v20 = vsel %vm316_vm0, %v796_v43, 0.0  ;;  %v1156_v31 = vsel %vm316_vm0, %v798_v60, 0.0  ;;  %v579_v2 = vld [vmem:[%s3236_s6 + $0x3a0] sm:$0xff]  ;;  %v1162_v7 = vsel %vm316_vm0, %v800_v55, 0.0 }
 0x24a   : > { %v1468_v42 = vsel %vm1332_vm2, %v1467_v61, %v1466_v5  ;;  %1139 = vadd.xlane.f32.xlu2 %v1138_v6  ;;  %v799_v6 = vmul.f32 %v2985_v27, %v579_v2 }
 0x24b   : > { %v1470_v0 = vsel %vm1336_vm3, %v1469_v63, %v1468_v42  ;;  %v1080_v26 = vpop.xlane.xlu0 %1079 }
 0x24c   : > { %v1486_v15 = vperm.slane %v1080_v26, %v2252_v36  ;;  %v1101_v17 = vpop.xlane.xlu2 %1100 }
 0x24e   : > { %v1487_v28 = vsel %vm1328_vm1, %v1486_v15, %v1485_v8  ;;  %v1038_v29 = vpop.xlane.xlu1 %1037  ;;  %v1159_v8 = vsel %vm316_vm0, %v799_v6, 0.0  ;;  %v1174_v15 = vsel %vm316_vm0, %v804_v1, 0.0 }
 0x24f   : > { %v1489_v30 = vsel %vm1332_vm2, %v1488_v56, %v1487_v28  ;;  %v1462_v40 = vperm.slane %v1038_v29, %v2281_v57  ;;  %v807_v29 = vmul.f32 %v3018_v50, %v587_v23 }
 0x250   : > { %v2961_v14 = vsel %vm1336_vm3, %v1490_v24, %v1489_v30  ;;  %v1499_v24 = vperm.slane %v1101_v17, %v2246_v34 }
 0x251   : > { %v1463_v19 = vsel %vm1336_vm3, %v1462_v40, %v2871_v37  ;;  %1133 = vadd.xlane.f32.xlu1 %v1132_v22  ;;  %1154 = vadd.xlane.f32.xlu0 %v1153_v35  ;;  %v1183_v35 = vsel %vm316_vm0, %v807_v29, 0.0  ;;  %v581_v29 = vld [vmem:[%s3236_s6 + $0x3b0] sm:$0xff] }
 0x252   : > { %v1577_v44 = vsel %vm1557_vm5, %v1463_v19, %v1576_v53  ;;  %1142 = vadd.xlane.f32.xlu2 %v1141_v38  ;;  %v1471_v53 = vperm.slane %v2880_v54, %v2246_v34  ;;  %v1144_v54 = vsel %vm316_vm0, %v794_v10, 0.0 }
 0x253   : > { %v1578_v37 = vsel %vm1559_vm6, %v1470_v0, %v1577_v44  ;;  %v2977_v45 = vpop.xlane.xlu0 %1088  ;;  %v1479_v0 = vperm.slane %v2868_v9, %v2252_v36 }
 0x254   : > { %v1116_v41 = vpop.xlane.xlu2 %1115 }
 0x255   : > { %v1507_v6 = vperm.slane %v1116_v41, %v2252_v36 }
 0x256   : > { %v1056_v3 = vpop.xlane.xlu1 %1055 }
 0x257   : > { %v1472_v58 = vperm.slane %v1056_v3, %v2252_v36  ;;  %v1492_v3 = vperm.slane %v2977_v45, %v2246_v34 }
 0x259   : > { %v1473_v61 = vsel %vm1328_vm1, %v1472_v58, %v1471_v53  ;;  %1151 = vadd.xlane.f32.xlu1 %v1150_v20  ;;  %1157 = vadd.xlane.f32.xlu0 %v1156_v31 }
 0x25a   : > { %v1475_v4 = vsel %vm1332_vm2, %v1474_v25, %v1473_v61  ;;  %1145 = vadd.xlane.f32.xlu2 %v1144_v54 }
 0x25b   : > { %v1477_v63 = vsel %vm1336_vm3, %v1476_v21, %v1475_v4  ;;  %v1095_v5 = vpop.xlane.xlu0 %1094 }
 0x25c   : > { %v1579_v42 = vsel %vm1561_vm7, %v1477_v63, %v1578_v37  ;;  %v1495_v58 = vperm.slane %v1095_v5, %v2266_v47  ;;  %v1125_v25 = vpop.xlane.xlu2 %1124 }
 0x25d   : > { %v1513_v61 = vperm.slane %v1125_v25, %v2246_v34 }
 0x25e   : > { %v1065_v11 = vpop.xlane.xlu1 %1064 }
 0x25f   : > { %v1478_v26 = vperm.slane %v1065_v11, %v2246_v34 }
 0x261   : > { %v1480_v56 = vsel %vm1328_vm1, %v1479_v0, %v1478_v26  ;;  %1160 = vadd.xlane.f32.xlu1 %v1159_v8  ;;  %1175 = vadd.xlane.f32.xlu0 %v1174_v15 }
 0x262   : > { %1163 = vadd.xlane.f32.xlu2 %v1162_v7 }
 0x263   : > { %v1104_v9 = vpop.xlane.xlu0 %1103 }
 0x264   : > { %v1500_v28 = vperm.slane %v1104_v9, %v2252_v36 }
 0x266   : > { %v1501_v30 = vsel %vm1328_vm1, %v1500_v28, %v1499_v24  ;;  %v1071_v40 = vpop.xlane.xlu1 %1070 }
 0x267   : > { %v1481_v22 = vperm.slane %v1071_v40, %v2266_v47 }
 0x269   : > { %v1482_v19 = vsel %vm1332_vm2, %v1481_v22, %v1480_v56  ;;  %1184 = vadd.xlane.f32.xlu0 %v1183_v35  ;;  %v801_v22 = vmul.f32 %v2985_v27, %v581_v29 }
 0x26b   : > { %v1107_v38 = vpop.xlane.xlu0 %1106 }
 0x26c   : > { %v1502_v33 = vperm.slane %v1107_v38, %v2266_v47 }
 0x26e   : > { %v1503_v44 = vsel %vm1332_vm2, %v1502_v33, %v1501_v30  ;;  %v1074_v48 = vpop.xlane.xlu1 %1073 }
 0x26f   : > { %v1483_v37 = vperm.slane %v1074_v48, %v2281_v57 }
 0x271   : > { %v1484_v49 = vsel %vm1336_vm3, %v1483_v37, %v1482_v19  ;;  %v583_v37 = vld [vmem:[%s3236_s6 + $0x3c0] sm:$0xff] }
 0x272   : > { %v1580_v43 = vsel %vm1563_vm8, %v1484_v49, %v1579_v42 }
 0x273   : > { %v1128_v60 = vpop.xlane.xlu0 %1127  ;;  %v1581_v12 = vsel %vm1565_vm9, %v2961_v14, %v1580_v43 }
 0x274   : > { %v1514_v20 = vperm.slane %v1128_v60, %v2252_v36 }
 0x276   : > { %v1092_v10 = vpop.xlane.xlu1 %1091  ;;  %v1515_v2 = vsel %vm1328_vm1, %v1514_v20, %v1513_v61 }
 0x277   : > { %v1493_v53 = vperm.slane %v1092_v10, %v2252_v36  ;;  %v803_v10 = vmul.f32 %v2991_v13, %v583_v37  ;;  %v1654_v37 = vld [vmem:[%s3233_s3 + $0x18] sm:$0xff] }
 0x278   : > { %1683 = vmatpush.msra.mxu3 %v1654_v37 }
 0x279   : > { %v1494_v31 = vsel %vm1328_vm1, %v1493_v53, %v1492_v3  ;;  %v1171_v20 = vsel %vm316_vm0, %v803_v10, 0.0 }
 0x27a   : > { %v1496_v21 = vsel %vm1332_vm2, %v1495_v58, %v1494_v31 }
 0x27b   : > { %v1131_v54 = vpop.xlane.xlu0 %1130 }
 0x27c   : > { %v1516_v14 = vperm.slane %v1131_v54, %v2266_v47 }
 0x27e   : > { %v3050_v45 = vsel %vm1332_vm2, %v1516_v14, %v1515_v2  ;;  %v1098_v52 = vpop.xlane.xlu1 %1097 }
 0x27f   : > { %v1497_v4 = vperm.slane %v1098_v52, %v2281_v57 }
 0x281   : > { %v1498_v32 = vsel %vm1336_vm3, %v1497_v4, %v1496_v21 }
 0x282   : > { %v3055_v63 = vsel %vm1567_vm10, %v1498_v32, %v1581_v12 }
 0x286   : > { %v1113_v5 = vpop.xlane.xlu1 %1112 }
 0x287   : > { %v1506_v1 = vperm.slane %v1113_v5, %v2246_v34 }
 0x289   : > { %v1508_v46 = vsel %vm1328_vm1, %v1507_v6, %v1506_v1  ;;  %v589_v1 = vld [vmem:[%s3236_s6 + $0x3f0] sm:$0xff] }
 0x28e   : > { %v1119_v42 = vpop.xlane.xlu1 %1118 }
 0x28f   : > { %v1509_v55 = vperm.slane %v1119_v42, %v2266_v47  ;;  %v586_v42 = vld [vmem:[%s3236_s6 + $0x3d8] sm:$0xff] }
 0x291   : > { %v1510_v11 = vsel %vm1332_vm2, %v1509_v55, %v1508_v46  ;;  %v590_v46 = vld [vmem:[%s3236_s6 + $0x3f8] sm:$0xff] }
 0x296   : > { %v1110_v0 = vpop.xlane.xlu1 %1109 }
 0x297   : > { %v1504_v26 = vperm.slane %v1110_v0, %v2281_v57  ;;  %v809_v0 = vmul.f32 %v3018_v50, %v589_v1 }
 0x299   : > { %v1505_v8 = vsel %vm1336_vm3, %v1504_v26, %v1503_v44  ;;  %v1165_v44 = vsel %vm316_vm0, %v801_v22, 0.0  ;;  %v810_v26 = vmul.f32 %v3018_v50, %v590_v46 }
 0x29e   : > { %v1137_v30 = vpop.xlane.xlu1 %1136 }
 0x2a4   : > { %v421_v15 = vpop.xlane.xlu2 %420 }
 0x2a5   : > { %v431_v17 = vsub.f32 %v2873_v51, %v421_v15  ;;  %v806_v15 = vmul.f32 %v2991_v13, %v586_v42 }
 0x2a7   : > { %v435_v56 = vmul.f32 1.442695, %v431_v17 }
 0x2a9   : > { %1931 = vpow2.f32 %v435_v56 }
 0x2ac   : > { %v424_v7 = vpop.xlane.xlu2 %423 }
 0x2ad   : > { %v432_v23 = vsub.f32 %v2885_v18, %v424_v7 }
 0x2af   : > { %v3066_v9 = vpop.eup %1931  ;;  %v437_v24 = vmul.f32 1.442695, %v432_v23 }
 0x2b0   : > { %v443_v28 = vsel %vm316_vm0, %v3066_v9, 0.0 }
 0x2b1   : > { %1933 = vpow2.f32 %v437_v24  ;;  %444 = vadd.xlane.f32.xlu1 %v443_v28  ;;  %v1189_v24 = vsel %vm316_vm0, %v809_v0, 0.0  ;;  %v1192_v28 = vsel %vm316_vm0, %v810_v26, 0.0 }
 0x2b4   : > { %v427_v40 = vpop.xlane.xlu0 %426  ;;  %v1122_v51 = vpop.xlane.xlu2 %1121 }
 0x2b5   : > { %v433_v35 = vsub.f32 %v2904_v39, %v427_v40  ;;  %v1511_v18 = vperm.slane %v1122_v51, %v2281_v57  ;;  %v582_v39 = vld [vmem:[%s3236_s6 + $0x3b8] sm:$0xff] }
 0x2b6   : > { %v802_v43 = vmul.f32 %v2985_v27, %v582_v39  ;;  %v585_v27 = vld [vmem:[%s3236_s6 + $0x3d0] sm:$0xff] }
 0x2b7   : > { %v3076_v19 = vpop.eup %1933  ;;  %v439_v38 = vmul.f32 1.442695, %v433_v35  ;;  %v1512_v33 = vsel %vm1336_vm3, %v1511_v18, %v1510_v11  ;;  %v805_v14 = vmul.f32 %v2991_v13, %v585_v27  ;;  %v1520_v11 = vperm.slane %v1137_v30, %v2246_v34 }
 0x2b8   : > { %v1583_v41 = vsel %vm1555_vm4, %v1512_v33, %v1505_v8  ;;  %v446_v48 = vsel %vm316_vm0, %v3076_v19, 0.0  ;;  %v1168_v25 = vsel %vm316_vm0, %v802_v43, 0.0 }
 0x2b9   : > { %1935 = vpow2.f32 %v439_v38  ;;  %1166 = vadd.xlane.f32.xlu1 %v1165_v44  ;;  %447 = vadd.xlane.f32.xlu2 %v446_v48  ;;  %v1177_v6 = vsel %vm316_vm0, %v805_v14, 0.0 }
 0x2bc   : > { %v430_v49 = vpop.xlane.xlu1 %429  ;;  %v1149_v13 = vpop.xlane.xlu0 %1148 }
 0x2bd   : > { %v434_v60 = vsub.f32 %v2924_v59, %v430_v49  ;;  %v1140_v12 = vpop.xlane.xlu2 %1139  ;;  %v588_v59 = vld [vmem:[%s3236_s6 + $0x3e8] sm:$0xff]  ;;  %v1653_v49 = vld [vmem:[%s3233_s3 + $0x10] sm:$0xff] }
 0x2be   : > { %v808_v21 = vmul.f32 %v3018_v50, %v588_v59  ;;  %v1180_v50 = vsel %vm316_vm0, %v806_v15, 0.0  ;;  %1684 = vmatpush.msra.mxu3 %v1653_v49  ;;  %v1527_v59 = vperm.slane %v1149_v13, %v2246_v34 }
 0x2bf   : > { %v3092_v3 = vpop.eup %1935  ;;  %v441_v53 = vmul.f32 1.442695, %v434_v60  ;;  %v1652_v60 = vld [vmem:[%s3233_s3 + $0x8] sm:$0xff] }
 0x2c0   : > { %v449_v58 = vsel %vm316_vm0, %v3092_v3, 0.0  ;;  %v1186_v5 = vsel %vm316_vm0, %v808_v21, 0.0  ;;  %1685 = vmatpush.msra.mxu3 %v1652_v60 }
 0x2c1   : > { %1937 = vpow2.f32 %v441_v53  ;;  %450 = vadd.xlane.f32.xlu0 %v449_v58  ;;  %1169 = vadd.xlane.f32.xlu1 %v1168_v25 }
 0x2c2   : > { %1172 = vadd.xlane.f32.xlu2 %v1171_v20 }
 0x2c4   : > { %v1134_v31 = vpop.xlane.xlu1 %1133  ;;  %v1155_v30 = vpop.xlane.xlu0 %1154 }
 0x2c5   : > { %v1518_v61 = vperm.slane %v1134_v31, %v2281_v57  ;;  %v1143_v54 = vpop.xlane.xlu2 %1142  ;;  %v1530_v14 = vperm.slane %v1155_v30, %v2266_v47 }
 0x2c6   : > { %v1523_v55 = vperm.slane %v1143_v54, %v2266_v47 }
 0x2c7   : > { %v3107_v2 = vpop.eup %1937  ;;  %v1519_v52 = vsel %vm1336_vm3, %v1518_v61, %v3050_v45  ;;  %v1521_v45 = vperm.slane %v1140_v12, %v2252_v36 }
 0x2c8   : > { %v1584_v4 = vsel %vm1557_vm5, %v1519_v52, %v1583_v41  ;;  %v452_v32 = vsel %vm316_vm0, %v3107_v2, 0.0 }
 0x2c9   : > { %453 = vadd.xlane.f32.xlu0 %v452_v32  ;;  %1187 = vadd.xlane.f32.xlu1 %v1186_v5  ;;  %v1522_v17 = vsel %vm1328_vm1, %v1521_v45, %v1520_v11 }
 0x2ca   : > { %1178 = vadd.xlane.f32.xlu2 %v1177_v6  ;;  %v1524_v7 = vsel %vm1332_vm2, %v1523_v55, %v1522_v17 }
 0x2cc   : > { %v1152_v40 = vpop.xlane.xlu1 %1151  ;;  %v1158_v51 = vpop.xlane.xlu0 %1157 }
 0x2cd   : > { %v1146_v8 = vpop.xlane.xlu2 %1145  ;;  %v1532_v5 = vperm.slane %v1158_v51, %v2281_v57 }
 0x2ce   : > { %v1525_v56 = vperm.slane %v1146_v8, %v2281_v57 }
 0x2d0   : > { %v1526_v23 = vsel %vm1336_vm3, %v1525_v56, %v1524_v7 }
 0x2d1   : > { %v3138_v29 = vsel %vm1559_vm6, %v1526_v23, %v1584_v4  ;;  %1190 = vadd.xlane.f32.xlu0 %v1189_v24  ;;  %1193 = vadd.xlane.f32.xlu1 %v1192_v28 }
 0x2d2   : > { %1181 = vadd.xlane.f32.xlu2 %v1180_v50 }
 0x2d4   : > { %v1161_v22 = vpop.xlane.xlu1 %1160  ;;  %v1176_v35 = vpop.xlane.xlu0 %1175 }
 0x2d5   : > { %v1164_v18 = vpop.xlane.xlu2 %1163  ;;  %v1542_v42 = vperm.slane %v1176_v35, %v2252_v36 }
 0x2d6   : > { %v1535_v52 = vperm.slane %v1164_v18, %v2252_v36 }
 0x2dc   : > { %v1185_v41 = vpop.xlane.xlu0 %1184 }
 0x2dd   : > { %v1548_v55 = vperm.slane %v1185_v41, %v2246_v34 }
 0x324   : > { %v445_v38 = vpop.xlane.xlu1 %444 }
 0x325   : > { %1939 = vrcp.f32 %v445_v38 }
 0x32b   : > { %v1940_v33 = vpop.eup %1939 }
 0x32c   : > { %v1167_v44 = vpop.xlane.xlu1 %1166  ;;  %v448_v48 = vpop.xlane.xlu2 %447  ;;  %v459_v39 = vmul.f32 %v1940_v33, %v3066_v9 }
 0x32d   : > { %1941 = vrcp.f32 %v448_v48  ;;  %v1537_v4 = vperm.slane %v1167_v44, %v2266_v47  ;;  %v1930_v48 = vld [vmem:[%s3234_s4] ss:$0 sm:$0xff] }
 0x32e   : > { %v1594_v43 = vadd.f32 %v2455_v16, %v459_v39  ;;  %v1528_v16 = vperm.slane %v1152_v40, %v2252_v36 }
 0x330   : > { %1890 = vmatmul.msk.f32.vlgmr.msra.gmra.mxu2 %vm316_vm0, %v1594_v43  ;;  %v1529_v54 = vsel %vm1328_vm1, %v1528_v16, %v1527_v59 }
 0x331   : > { %v1531_v32 = vsel %vm1332_vm2, %v1530_v14, %v1529_v54 }
 0x332   : > { %v1533_v45 = vsel %vm1336_vm3, %v1532_v5, %v1531_v32 }
 0x333   : > { %v1942_v9 = vpop.eup %1941 }
 0x334   : > { %v451_v12 = vpop.xlane.xlu0 %450  ;;  %v1170_v10 = vpop.xlane.xlu1 %1169  ;;  %v460_v53 = vmul.f32 %v1942_v9, %v3076_v19  ;;  %v1700_v9 = vld [vmem:[%s3237_s7] sm:$0xff] }
 0x335   : > { %1943 = vrcp.f32 %v451_v12  ;;  %v1173_v58 = vpop.xlane.xlu2 %1172  ;;  %v1899_v12 = vld [vmem:[%s3237_s7 + $0x8] sm:$0xff] }
 0x336   : > { %v1595_v25 = vadd.f32 %v2847_v62, %v460_v53  ;;  %v1534_v62 = vperm.slane %v1161_v22, %v2246_v34  ;;  %v1541_v6 = vperm.slane %v1173_v58, %v2246_v34  ;;  %v1586_v34 = vsel %vm1561_vm7, %v1533_v45, %v3138_v29  ;;  %v1651_v29 = vld [vmem:[%s3233_s3] sm:$0xff]  ;;  %v1903_v53 = vld [vmem:[%s3237_s7 + $0x18] sm:$0xff] }
 0x337   : > { %1686 = vmatpush.msra.mxu3 %v1651_v29 }
 0x338   : > { %1891 = vmatmul.msk.f32.gmra.mxu2 %vm316_vm0, %v1595_v25  ;;  %v1536_v1 = vsel %vm1328_vm1, %v1535_v52, %v1534_v62  ;;  %v1543_v23 = vsel %vm1328_vm1, %v1542_v42, %v1541_v6 }
 0x339   : > { %v1538_v11 = vsel %vm1332_vm2, %v1537_v4, %v1536_v1 }
 0x33b   : > { %v1944_v20 = vpop.eup %1943 }
 0x33c   : > { %v454_v27 = vpop.xlane.xlu0 %453  ;;  %v1188_v31 = vpop.xlane.xlu1 %1187  ;;  %v461_v21 = vmul.f32 %v1944_v20, %v3092_v3  ;;  %v1539_v3 = vperm.slane %v1170_v10, %v2281_v57  ;;  %v1901_v10 = vld [vmem:[%s3237_s7 + $0x10] sm:$0xff] }
 0x33d   : > { %v1179_v61 = vpop.xlane.xlu2 %1178  ;;  %1945 = vrcp.f32 %v454_v27 }
 0x33e   : > { %v1596_v19 = vadd.f32 %v3055_v63, %v461_v21  ;;  %v1549_v63 = vperm.slane %v1188_v31, %v2252_v36  ;;  %v1544_v46 = vperm.slane %v1179_v61, %v2266_v47  ;;  %v1540_v8 = vsel %vm1336_vm3, %v1539_v3, %v1538_v11 }
 0x33f   : > { %v1587_v13 = vsel %vm1563_vm8, %v1540_v8, %v1586_v34 }
 0x340   : > { %1892 = vmatmul.msk.f32.gmra.mxu2 %vm316_vm0, %v1596_v19  ;;  %v1550_v24 = vsel %vm1328_vm1, %v1549_v63, %v1548_v55  ;;  %v1545_v28 = vsel %vm1332_vm2, %v1544_v46, %v1543_v23 }
 0x343   : > { %v1946_v7 = vpop.eup %1945 }
 0x344   : > { %v1191_v0 = vpop.xlane.xlu0 %1190  ;;  %v1194_v26 = vpop.xlane.xlu1 %1193  ;;  %v462_v40 = vmul.f32 %v1946_v7, %v3107_v2 }
 0x345   : > { %v1551_v15 = vperm.slane %v1191_v0, %v2266_v47  ;;  %v1553_v17 = vperm.slane %v1194_v26, %v2281_v57  ;;  %v1182_v56 = vpop.xlane.xlu2 %1181 }
 0x346   : > { %v1546_v36 = vperm.slane %v1182_v56, %v2281_v57 }
 0x347   : > { %v1552_v50 = vsel %vm1332_vm2, %v1551_v15, %v1550_v24 }
 0x348   : > { %v1554_v47 = vsel %vm1336_vm3, %v1553_v17, %v1552_v50  ;;  %v1547_v30 = vsel %vm1336_vm3, %v1546_v36, %v1545_v28 }
 0x349   : > { %v1588_v51 = vsel %vm1565_vm9, %v1547_v30, %v1587_v13 }
 0x34a   : > { %v1589_v22 = vsel %vm1567_vm10, %v1554_v47, %v1588_v51 }
 0x34b   : > { %v1597_v57 = vadd.f32 %v1589_v22, %v462_v40 }
 0x34d   : > { %1893 = vmatmul.msk.f32.gmra.mxu2 %vm316_vm0, %v1597_v57 }
 0x3b3   : > { %v1639_v35 = vpop.f32.mrf.mxu2 }
 0x3b4   : > { %1894 = vmatmul.msk.f32.vlgmr.msra.gmra.mxu3 %vm316_vm0, %v1639_v35 }
 0x3bb   : > { %v1642_v18 = vpop.f32.mrf.mxu2 }
 0x3bc   : > { %1895 = vmatmul.msk.f32.gmra.mxu3 %vm316_vm0, %v1642_v18 }
 0x3c3   : > { %v1645_v38 = vpop.f32.mrf.mxu2 }
 0x3c4   : > { %1896 = vmatmul.msk.f32.gmra.mxu3 %vm316_vm0, %v1645_v38 }
 0x3d0   : > { %v1648_v2 = vpop.f32.mrf.mxu2 }
 0x3d1   : > { %1897 = vmatmul.msk.f32.gmra.mxu3 %vm316_vm0, %v1648_v2 }
 0x437   : > { %v1688_v33 = vpop.f32.mrf.mxu3 }
 0x438   : > { %v1689_v60 = vadd.f32 %v1930_v48, %v1688_v33 }
 0x43f   : > { %v1691_v41 = vpop.f32.mrf.mxu3 }
 0x440   : > { %v1692_v43 = vadd.f32 %v1930_v48, %v1691_v41 }
 0x447   : > { %v1694_v44 = vpop.f32.mrf.mxu3 }
 0x448   : > { %v1695_v49 = vadd.f32 %v1930_v48, %v1694_v44 }
 0x454   : > { %v1697_v39 = vpop.f32.mrf.mxu3 }
 0x455   : > { %v1698_v37 = vadd.f32 %v1930_v48, %v1697_v39 }
 0x457   : > { %1716 = vmatpush.msrb.mxu0 %v1698_v37  ;;  %1741 = vmatpush.msrb.mxu2 %v1698_v37 }
 0x458   : > { %1766 = vmatpush.msrb.mxu3 %v1698_v37 }
 0x459   : > { %1717 = vmatpush.msrb.mxu0 %v1695_v49  ;;  %1742 = vmatpush.msrb.mxu2 %v1695_v49 }
 0x45a   : > { %1767 = vmatpush.msrb.mxu3 %v1695_v49 }
 0x45b   : > { %1718 = vmatpush.msrb.mxu0 %v1692_v43  ;;  %1743 = vmatpush.msrb.mxu2 %v1692_v43 }
 0x45c   : > { %1768 = vmatpush.msrb.mxu3 %v1692_v43 }
 0x45d   : > { %1719 = vmatpush.msrb.mxu0 %v1689_v60  ;;  %1744 = vmatpush.msrb.mxu2 %v1689_v60 }
 0x45e   : > { %1769 = vmatpush.msrb.mxu3 %v1689_v60  ;;  %1898 = vmatmul.msk.f32.vlgmr.msrb.gmra.mxu0 %vm316_vm0, %v1700_v9 }
 0x45f   : > { %1900 = vmatmul.msk.f32.vlgmr.msrb.gmra.mxu2 %vm316_vm0, %v1899_v12  ;;  %1902 = vmatmul.msk.f32.vlgmr.msrb.gmra.mxu3 %vm316_vm0, %v1901_v10 }
 0x460   : > { %1791 = vmatpush.msra.mxu0 %v1698_v37 }
 0x462   : > { %1792 = vmatpush.msra.mxu0 %v1695_v49 }
 0x464   : > { %1793 = vmatpush.msra.mxu0 %v1692_v43 }
 0x466   : > { %1794 = vmatpush.msra.mxu0 %v1689_v60 }
 0x467   : > { %1904 = vmatmul.msk.f32.vlgmr.msra.gmra.mxu0 %vm316_vm0, %v1903_v53 }
 0x4db   : > { %v1721_v58 = vpop.f32.mrf.mxu0 }
 0x4e2   : > { %v1746_v25 = vpop.f32.mrf.mxu2  ;;  %v1771_v16 = vpop.f32.mrf.mxu3 }
 0x4e3   : > { %1804 = vrot.lane.b32.xlu0 %v1771_v16, %s1956_s11  ;;  %1800 = vrot.lane.b32.xlu2 %v1746_v25, %s1957_s9 }
 0x4e4   : > { %v1796_v20 = vpop.f32.mrf.mxu0 }
 0x4e5   : > { %1808 = vrot.lane.b32.xlu1 %v1796_v20, %s1955_s23 }
 0x53d   : > { %v1801_v59 = vpop.permute.xlu2 %1800 }
 0x53e   : > { %v1811_v27 = vsel %vm316_vm0, %v1721_v58, %v1801_v59 }
 0x555   : > { %v1805_v31 = vpop.permute.xlu0 %1804 }
 0x556   : > { %v1813_v21 = vsel %vm1812_vm11, %v1811_v27, %v1805_v31 }
 0x557   : > { %v1809_v61 = vpop.permute.xlu1 %1808 }
 0x558   : > { %v1815_v54 = vsel %vm1814_vm12, %v1813_v21, %v1809_v61 }
 0x559   : > { %1816 = vst [vmem:[%s303_s14] sm:$0xff] %v1815_v54 }
 0x55a PF: > { %s18_s27 = sadd.s32 1, %s1953_s27  }
 0x55b   : > { %p15_p4 = scmp.ge.s32.totalorder %s18_s27, 4  }
 0x55d   :  { %17 = sbr.rel (!%p15_p4) target bundleno = 1 (0x1), region = 85 }

</bundles_post_ra>
